<compile_context>
chip_gen: v7x
topology: tpu7x:2x2x1
jax: 0.10.0
libtpu: 0.0.40
codegen_flags: <defaults>
</compile_context>

<pallas_src>
import functools

import jax
import jax.numpy as jnp
from jax import lax
from jax.experimental import pallas as pl
from jax.experimental.pallas import tpu as pltpu


def _basic_block_kernel(x_ref, w_ref, s_ref, b_ref, o_ref, buf0, buf1,
                        *, H, W, Cin0, Cpad, n_layers):
    """Fused 4x(conv3x3 + folded BN) + final ReLU for one batch element.

    x_ref : (1, Cin0, H*W)          input activation, NC(HW)
    w_ref : (n_layers*9, Cpad, Cpad) per-tap weights, (cout, cin), zero padded
    s_ref : (n_layers, Cpad, 1)      folded BN scale
    b_ref : (n_layers, Cpad, 1)      folded BN bias
    o_ref : (1, Cpad, H*W)           output activation, NC(HW)
    buf0/buf1 : (Cpad, (H+4)*W)      VMEM ping-pong canvases with zero halos
    """
    HW = H * W

    # Halo rows of the (H+4, W) flattened canvas must be zero; the interior is
    # fully overwritten each layer, so one cheap zero-fill per grid step keeps
    # every halo / wrap-around read well-defined.
    buf0[...] = jnp.zeros_like(buf0)
    buf1[...] = jnp.zeros_like(buf1)

    # Place the input image into the canvas interior: columns [2W, 2W+HW)
    # correspond to image rows 0..H-1 (rows 0..1 above are zero pad).
    buf0[0:Cin0, 2 * W:2 * W + HW] = x_ref[0].astype(jnp.float32)

    # Masks for the horizontal-boundary taps: kx=0 reads x-1 (wrong at x==0),
    # kx=2 reads x+1 (wrong at x==W-1). Built once, broadcast over sublanes.
    xpos = lax.broadcasted_iota(jnp.int32, (1, HW), 1) % W
    not_left = xpos != 0
    not_right = xpos != (W - 1)

    bufs = (buf0, buf1)
    for l in range(n_layers):
        src = bufs[l % 2]
        acc = jnp.zeros((Cpad, HW), jnp.float32)
        for ky in range(3):
            for kx in range(3):
                # Contiguous column-shifted slice of the flattened canvas:
                # output o=y*W+x reads column o + (ky+1)*W + (kx-1).
                shift = (ky + 1) * W + (kx - 1)
                patch = src[:, shift:shift + HW]
                if kx == 0:
                    patch = jnp.where(not_left, patch, 0.0)
                elif kx == 2:
                    patch = jnp.where(not_right, patch, 0.0)
                acc = acc + jnp.dot(w_ref[l * 9 + ky * 3 + kx], patch,
                                    preferred_element_type=jnp.float32)

        y = acc * s_ref[l] + b_ref[l]            # folded BN, (Cpad,1) broadcast
        if l == n_layers - 1:
            y = jnp.maximum(y, 0.0)              # final ReLU
            o_ref[0] = y.astype(o_ref.dtype)     # lane-dense (Cpad, HW) store
        else:
            bufs[(l + 1) % 2][:, 2 * W:2 * W + HW] = y


def fold_bn(gamma, beta, running_mean, running_var, eps=1e-5):
    scale = gamma / jnp.sqrt(running_var + eps)
    bias = beta - running_mean * scale
    return scale, bias


def _pack_params(params, in_channel):
    """Pack per-layer (HWIO weight, bn_scale, bn_bias) into kernel operands."""
    n_layers = len(params)
    Cpad = in_channel
    for w, _, _ in params:
        Cpad = max(Cpad, w.shape[2], w.shape[3])

    w_list, s_list, b_list = [], [], []
    for (w, scale, bias) in params:
        kh, kw, cin, cout = w.shape
        # HWIO -> (tap, Cout, Cin), zero padded to (9, Cpad, Cpad).
        wt = jnp.transpose(w, (0, 1, 3, 2)).reshape(kh * kw, cout, cin)
        wt = jnp.pad(wt, ((0, 0), (0, Cpad - cout), (0, Cpad - cin)))
        w_list.append(wt.astype(jnp.float32))
        s_list.append(jnp.pad(scale.astype(jnp.float32), (0, Cpad - cout)))
        b_list.append(jnp.pad(bias.astype(jnp.float32), (0, Cpad - cout)))

    w_all = jnp.concatenate(w_list, axis=0)              # (L*9, Cpad, Cpad)
    s_all = jnp.stack(s_list).reshape(n_layers, Cpad, 1)
    b_all = jnp.stack(b_list).reshape(n_layers, Cpad, 1)
    return w_all, s_all, b_all, Cpad


def make_basic_block_params(key, in_channel, hidden_dim, out_channel):
    """Deterministic synthetic parameters matching the module's layer shapes.

    NOTE: the PyTorch module's last BatchNorm2d is sized `hidden_dim`, so the
    module is only runnable when out_channel == hidden_dim; we assume that.
    """
    assert out_channel == hidden_dim, "PyTorch module requires out_channel == hidden_dim"
    chans = [(in_channel, hidden_dim),
             (hidden_dim, hidden_dim),
             (hidden_dim, hidden_dim),
             (hidden_dim, out_channel)]
    params = []
    for (cin, cout) in chans:
        key, kw, kg, kb, km, kv = jax.random.split(key, 6)
        w = jax.random.normal(kw, (3, 3, cin, cout), jnp.float32) * 0.1  # HWIO
        gamma = 1.0 + 0.1 * jax.random.normal(kg, (cout,), jnp.float32)
        beta = 0.1 * jax.random.normal(kb, (cout,), jnp.float32)
        rmean = 0.1 * jax.random.normal(km, (cout,), jnp.float32)
        rvar = jnp.abs(jax.random.normal(kv, (cout,), jnp.float32)) + 0.5
        scale, bias = fold_bn(gamma, beta, rmean, rvar)
        params.append((w, scale, bias))
    return params


def basic_block_forward(x_nchw, params):
    """Forward pass matching BasicBlock.forward (inference-mode BN), NCHW I/O."""
    N, Cin0, H, W = x_nchw.shape
    n_layers = len(params)
    c_out = params[-1][0].shape[-1]
    w_all, s_all, b_all, Cpad = _pack_params(params, Cin0)

    HW = H * W
    canvas = (H + 4) * W          # flattened padded spatial length per channel

    kernel = functools.partial(_basic_block_kernel, H=H, W=W, Cin0=Cin0,
                               Cpad=Cpad, n_layers=n_layers)

    x_flat = x_nchw.reshape(N, Cin0, HW)   # free metadata reshape (stays NCHW)

    out = pl.pallas_call(
        kernel,
        out_shape=jax.ShapeDtypeStruct((N, Cpad, HW), x_nchw.dtype),
        grid_spec=pltpu.PrefetchScalarGridSpec(
            num_scalar_prefetch=0,
            grid=(N,),
            in_specs=[
                pl.BlockSpec((1, Cin0, HW), lambda n: (n, 0, 0)),
                pl.BlockSpec((n_layers * 9, Cpad, Cpad), lambda n: (0, 0, 0)),
                pl.BlockSpec((n_layers, Cpad, 1), lambda n: (0, 0, 0)),
                pl.BlockSpec((n_layers, Cpad, 1), lambda n: (0, 0, 0)),
            ],
            out_specs=pl.BlockSpec((1, Cpad, HW), lambda n: (n, 0, 0)),
            scratch_shapes=[
                pltpu.VMEM((Cpad, canvas), jnp.float32),
                pltpu.VMEM((Cpad, canvas), jnp.float32),
            ],
        ),
        compiler_params=pltpu.CompilerParams(
            dimension_semantics=("parallel",),
        ),
    )(x_flat, w_all, s_all, b_all)

    # Drop channel padding (no-op when out_channel == Cpad) and restore NCHW.
    return out[:, :c_out, :].reshape(N, c_out, H, W)


def basic_block_reference(x_nchw, params):
    """Pure-JAX reference (lax conv) for correctness checking (NCHW)."""
    x = x_nchw
    n_layers = len(params)
    for i, (w, scale, bias) in enumerate(params):
        y = lax.conv_general_dilated(
            x, w, window_strides=(1, 1), padding="SAME",
            dimension_numbers=("NCHW", "HWIO", "NCHW"))
        y = y * scale[None, :, None, None] + bias[None, :, None, None]
        if i == n_layers - 1:
            y = jnp.maximum(y, 0.0)
        x = y
    return x


if __name__ == "__main__":
    key = jax.random.PRNGKey(0)
    k_x, k_p = jax.random.split(key)

    N, Cin, H, W = 2, 4, 16, 16
    hidden, Cout = 8, 8  # out_channel must equal hidden_dim (see note above)

    x = jax.random.normal(k_x, (N, Cin, H, W), jnp.float32)  # NCHW like PyTorch
    params = make_basic_block_params(k_p, Cin, hidden, Cout)

    out = basic_block_forward(x, params)
    out = jax.block_until_ready(out)

    ref = jax.block_until_ready(basic_block_reference(x, params))
    assert out.shape == (N, Cout, H, W)
    assert jnp.allclose(out, ref, atol=1e-4, rtol=1e-4), "mismatch vs reference"

    print("KERNEL_OK")
</pallas_src>

<mosaic_0001>
module attributes {stable_mosaic.version = 11 : i64} {
  func.func @_basic_block_kernel(%arg0: i32, %arg1: memref<1x4x256xf32, #tpu.memory_space<vmem>>, %arg2: memref<36x8x8xf32, #tpu.memory_space<vmem>>, %arg3: memref<4x8x1xf32, #tpu.memory_space<vmem>>, %arg4: memref<4x8x1xf32, #tpu.memory_space<vmem>>, %arg5: memref<1x8x256xf32, #tpu.memory_space<vmem>>, %arg6: memref<8x320xf32, #tpu.memory_space<vmem>>, %arg7: memref<8x320xf32, #tpu.memory_space<vmem>>) attributes {dimension_semantics = [#tpu.dimension_semantics<parallel>], iteration_bounds = array<i64: 2>, scalar_prefetch = 0 : i64, scratch_operands = 2 : i64, tpu.core_type = #tpu.core_type<tc>, window_params = [{transform_indices = @transform_0, window_bounds = array<i64: 1, 4, 256>}, {pipeline_mode = #tpu.pipeline_mode<synchronous>, transform_indices = @transform_1, window_bounds = array<i64: 36, 8, 8>}, {pipeline_mode = #tpu.pipeline_mode<synchronous>, transform_indices = @transform_2, window_bounds = array<i64: 4, 8, 1>}, {pipeline_mode = #tpu.pipeline_mode<synchronous>, transform_indices = @transform_3, window_bounds = array<i64: 4, 8, 1>}, {transform_indices = @transform_4, window_bounds = array<i64: 1, 8, 256>}]} {
    %cst = arith.constant 0.000000e+00 : f32
    %0 = vector.broadcast %cst : f32 to vector<8x320xf32>
    %c0 = arith.constant 0 : index
    %c0_0 = arith.constant 0 : index
    %1 = vector.load %arg6[%c0, %c0_0] : memref<8x320xf32, #tpu.memory_space<vmem>>, vector<8x320xf32>
    tpu.vector_store %arg6[%c0, %c0_0], %0 {strides = array<i32>} : memref<8x320xf32, #tpu.memory_space<vmem>>, vector<8x320xf32>,
    %cst_1 = arith.constant 0.000000e+00 : f32
    %2 = vector.broadcast %cst_1 : f32 to vector<8x320xf32>
    %c0_2 = arith.constant 0 : index
    %c0_3 = arith.constant 0 : index
    %3 = vector.load %arg7[%c0_2, %c0_3] : memref<8x320xf32, #tpu.memory_space<vmem>>, vector<8x320xf32>
    tpu.vector_store %arg7[%c0_2, %c0_3], %2 {strides = array<i32>} : memref<8x320xf32, #tpu.memory_space<vmem>>, vector<8x320xf32>,
    %c0_4 = arith.constant 0 : index
    %c0_5 = arith.constant 0 : index
    %c0_6 = arith.constant 0 : index
    %4 = vector.load %arg1[%c0_4, %c0_5, %c0_6] : memref<1x4x256xf32, #tpu.memory_space<vmem>>, vector<1x4x256xf32>
    %5 = vector.shape_cast %4 : vector<1x4x256xf32> to vector<4x256xf32>
    %c0_7 = arith.constant 0 : index
    %c32 = arith.constant 32 : index
    %6 = vector.load %arg6[%c0_7, %c32] : memref<8x320xf32, #tpu.memory_space<vmem>>, vector<4x256xf32>
    tpu.vector_store %arg6[%c0_7, %c32], %5 {strides = array<i32>} : memref<8x320xf32, #tpu.memory_space<vmem>>, vector<4x256xf32>,
    %7 = tpu.iota {dimensions = array<i32: 1>} : vector<1x256xi32>
    %c16_i32 = arith.constant 16 : i32
    %c0_i32 = arith.constant 0 : i32
    %8 = arith.cmpi eq, %c16_i32, %c0_i32 : i32
    %c1_i32 = arith.constant 1 : i32
    %9 = arith.select %8, %c1_i32, %c16_i32 : i32
    %10 = vector.broadcast %9 : i32 to vector<1x256xi32>
    %11 = arith.remsi %7, %10 : vector<1x256xi32>
    %c0_i32_8 = arith.constant 0 : i32
    %12 = vector.broadcast %c0_i32_8 : i32 to vector<1x256xi32>
    %13 = arith.cmpi ne, %11, %12 : vector<1x256xi32>
    %c0_i32_9 = arith.constant 0 : i32
    %14 = vector.broadcast %c0_i32_9 : i32 to vector<1x256xi32>
    %15 = arith.cmpi slt, %11, %14 : vector<1x256xi32>
    %c0_i32_10 = arith.constant 0 : i32
    %16 = arith.cmpi slt, %9, %c0_i32_10 : i32
    %17 = vector.broadcast %16 : i1 to vector<1x256xi1>
    %18 = vector.broadcast %17 : vector<1x256xi1> to vector<1x256xi1>
    %19 = arith.xori %15, %18 : vector<1x256xi1>
    %20 = arith.andi %19, %13 : vector<1x256xi1>
    %21 = vector.broadcast %9 : i32 to vector<1x256xi32>
    %22 = arith.addi %11, %21 : vector<1x256xi32>
    %23 = arith.select %20, %22, %11 : vector<1x256xi1>, vector<1x256xi32>
    %c0_i32_11 = arith.constant 0 : i32
    %24 = vector.broadcast %c0_i32_11 : i32 to vector<1x256xi32>
    %25 = arith.cmpi ne, %23, %24 : vector<1x256xi32>
    %c15_i32 = arith.constant 15 : i32
    %26 = vector.broadcast %c15_i32 : i32 to vector<1x256xi32>
    %27 = arith.cmpi ne, %23, %26 : vector<1x256xi32>
    %cst_12 = arith.constant 0.000000e+00 : f32
    %28 = vector.broadcast %cst_12 : f32 to vector<8x256xf32>
    %c0_13 = arith.constant 0 : index
    %c15 = arith.constant 15 : index
    %29 = vector.load %arg6[%c0_13, %c15] : memref<8x320xf32, #tpu.memory_space<vmem>>, vector<8x256xf32>
    %cst_14 = arith.constant 0.000000e+00 : f32
    %30 = vector.shape_cast %25 : vector<1x256xi1> to vector<1x256xi1>
    %31 = vector.broadcast %30 : vector<1x256xi1> to vector<8x256xi1>
    %32 = vector.broadcast %cst_14 : f32 to vector<8x256xf32>
    %33 = arith.select %31, %29, %32 : vector<8x256xi1>, vector<8x256xf32>
    %c0_15 = arith.constant 0 : index
    %c0_16 = arith.constant 0 : index
    %c0_17 = arith.constant 0 : index
    %34 = vector.load %arg2[%c0_15, %c0_16, %c0_17] : memref<36x8x8xf32, #tpu.memory_space<vmem>>, vector<1x8x8xf32>
    %35 = vector.shape_cast %34 : vector<1x8x8xf32> to vector<8x8xf32>
    %cst_18 = arith.constant dense<0.000000e+00> : vector<8x256xf32>
    %36 = tpu.matmul %35, %33, %cst_18 {dimension_numbers = #tpu.dot_dimension_numbers<[1], [0], [0], [1], [0, 0, 1, 1], [], []>} : vector<8x8xf32>, vector<8x256xf32>, vector<8x256xf32> -> vector<8x256xf32>
    %37 = arith.addf %28, %36 : vector<8x256xf32>
    %c0_19 = arith.constant 0 : index
    %c16 = arith.constant 16 : index
    %38 = vector.load %arg6[%c0_19, %c16] : memref<8x320xf32, #tpu.memory_space<vmem>>, vector<8x256xf32>
    %c1 = arith.constant 1 : index
    %c0_20 = arith.constant 0 : index
    %c0_21 = arith.constant 0 : index
    %39 = vector.load %arg2[%c1, %c0_20, %c0_21] : memref<36x8x8xf32, #tpu.memory_space<vmem>>, vector<1x8x8xf32>
    %40 = vector.shape_cast %39 : vector<1x8x8xf32> to vector<8x8xf32>
    %cst_22 = arith.constant dense<0.000000e+00> : vector<8x256xf32>
    %41 = tpu.matmul %40, %38, %cst_22 {dimension_numbers = #tpu.dot_dimension_numbers<[1], [0], [0], [1], [0, 0, 1, 1], [], []>} : vector<8x8xf32>, vector<8x256xf32>, vector<8x256xf32> -> vector<8x256xf32>
    %42 = arith.addf %37, %41 : vector<8x256xf32>
    %c0_23 = arith.constant 0 : index
    %c17 = arith.constant 17 : index
    %43 = vector.load %arg6[%c0_23, %c17] : memref<8x320xf32, #tpu.memory_space<vmem>>, vector<8x256xf32>
    %cst_24 = arith.constant 0.000000e+00 : f32
    %44 = vector.shape_cast %27 : vector<1x256xi1> to vector<1x256xi1>
    %45 = vector.broadcast %44 : vector<1x256xi1> to vector<8x256xi1>
    %46 = vector.broadcast %cst_24 : f32 to vector<8x256xf32>
    %47 = arith.select %45, %43, %46 : vector<8x256xi1>, vector<8x256xf32>
    %c2 = arith.constant 2 : index
    %c0_25 = arith.constant 0 : index
    %c0_26 = arith.constant 0 : index
    %48 = vector.load %arg2[%c2, %c0_25, %c0_26] : memref<36x8x8xf32, #tpu.memory_space<vmem>>, vector<1x8x8xf32>
    %49 = vector.shape_cast %48 : vector<1x8x8xf32> to vector<8x8xf32>
    %cst_27 = arith.constant dense<0.000000e+00> : vector<8x256xf32>
    %50 = tpu.matmul %49, %47, %cst_27 {dimension_numbers = #tpu.dot_dimension_numbers<[1], [0], [0], [1], [0, 0, 1, 1], [], []>} : vector<8x8xf32>, vector<8x256xf32>, vector<8x256xf32> -> vector<8x256xf32>
    %51 = arith.addf %42, %50 : vector<8x256xf32>
    %c0_28 = arith.constant 0 : index
    %c31 = arith.constant 31 : index
    %52 = vector.load %arg6[%c0_28, %c31] : memref<8x320xf32, #tpu.memory_space<vmem>>, vector<8x256xf32>
    %cst_29 = arith.constant 0.000000e+00 : f32
    %53 = vector.shape_cast %25 : vector<1x256xi1> to vector<1x256xi1>
    %54 = vector.broadcast %53 : vector<1x256xi1> to vector<8x256xi1>
    %55 = vector.broadcast %cst_29 : f32 to vector<8x256xf32>
    %56 = arith.select %54, %52, %55 : vector<8x256xi1>, vector<8x256xf32>
    %c3 = arith.constant 3 : index
    %c0_30 = arith.constant 0 : index
    %c0_31 = arith.constant 0 : index
    %57 = vector.load %arg2[%c3, %c0_30, %c0_31] : memref<36x8x8xf32, #tpu.memory_space<vmem>>, vector<1x8x8xf32>
    %58 = vector.shape_cast %57 : vector<1x8x8xf32> to vector<8x8xf32>
    %cst_32 = arith.constant dense<0.000000e+00> : vector<8x256xf32>
    %59 = tpu.matmul %58, %56, %cst_32 {dimension_numbers = #tpu.dot_dimension_numbers<[1], [0], [0], [1], [0, 0, 1, 1], [], []>} : vector<8x8xf32>, vector<8x256xf32>, vector<8x256xf32> -> vector<8x256xf32>
    %60 = arith.addf %51, %59 : vector<8x256xf32>
    %c0_33 = arith.constant 0 : index
    %c32_34 = arith.constant 32 : index
    %61 = vector.load %arg6[%c0_33, %c32_34] : memref<8x320xf32, #tpu.memory_space<vmem>>, vector<8x256xf32>
    %c4 = arith.constant 4 : index
    %c0_35 = arith.constant 0 : index
    %c0_36 = arith.constant 0 : index
    %62 = vector.load %arg2[%c4, %c0_35, %c0_36] : memref<36x8x8xf32, #tpu.memory_space<vmem>>, vector<1x8x8xf32>
    %63 = vector.shape_cast %62 : vector<1x8x8xf32> to vector<8x8xf32>
    %cst_37 = arith.constant dense<0.000000e+00> : vector<8x256xf32>
    %64 = tpu.matmul %63, %61, %cst_37 {dimension_numbers = #tpu.dot_dimension_numbers<[1], [0], [0], [1], [0, 0, 1, 1], [], []>} : vector<8x8xf32>, vector<8x256xf32>, vector<8x256xf32> -> vector<8x256xf32>
    %65 = arith.addf %60, %64 : vector<8x256xf32>
    %c0_38 = arith.constant 0 : index
    %c33 = arith.constant 33 : index
    %66 = vector.load %arg6[%c0_38, %c33] : memref<8x320xf32, #tpu.memory_space<vmem>>, vector<8x256xf32>
    %cst_39 = arith.constant 0.000000e+00 : f32
    %67 = vector.shape_cast %27 : vector<1x256xi1> to vector<1x256xi1>
    %68 = vector.broadcast %67 : vector<1x256xi1> to vector<8x256xi1>
    %69 = vector.broadcast %cst_39 : f32 to vector<8x256xf32>
    %70 = arith.select %68, %66, %69 : vector<8x256xi1>, vector<8x256xf32>
    %c5 = arith.constant 5 : index
    %c0_40 = arith.constant 0 : index
    %c0_41 = arith.constant 0 : index
    %71 = vector.load %arg2[%c5, %c0_40, %c0_41] : memref<36x8x8xf32, #tpu.memory_space<vmem>>, vector<1x8x8xf32>
    %72 = vector.shape_cast %71 : vector<1x8x8xf32> to vector<8x8xf32>
    %cst_42 = arith.constant dense<0.000000e+00> : vector<8x256xf32>
    %73 = tpu.matmul %72, %70, %cst_42 {dimension_numbers = #tpu.dot_dimension_numbers<[1], [0], [0], [1], [0, 0, 1, 1], [], []>} : vector<8x8xf32>, vector<8x256xf32>, vector<8x256xf32> -> vector<8x256xf32>
    %74 = arith.addf %65, %73 : vector<8x256xf32>
    %c0_43 = arith.constant 0 : index
    %c47 = arith.constant 47 : index
    %75 = vector.load %arg6[%c0_43, %c47] : memref<8x320xf32, #tpu.memory_space<vmem>>, vector<8x256xf32>
    %cst_44 = arith.constant 0.000000e+00 : f32
    %76 = vector.shape_cast %25 : vector<1x256xi1> to vector<1x256xi1>
    %77 = vector.broadcast %76 : vector<1x256xi1> to vector<8x256xi1>
    %78 = vector.broadcast %cst_44 : f32 to vector<8x256xf32>
    %79 = arith.select %77, %75, %78 : vector<8x256xi1>, vector<8x256xf32>
    %c6 = arith.constant 6 : index
    %c0_45 = arith.constant 0 : index
    %c0_46 = arith.constant 0 : index
    %80 = vector.load %arg2[%c6, %c0_45, %c0_46] : memref<36x8x8xf32, #tpu.memory_space<vmem>>, vector<1x8x8xf32>
    %81 = vector.shape_cast %80 : vector<1x8x8xf32> to vector<8x8xf32>
    %cst_47 = arith.constant dense<0.000000e+00> : vector<8x256xf32>
    %82 = tpu.matmul %81, %79, %cst_47 {dimension_numbers = #tpu.dot_dimension_numbers<[1], [0], [0], [1], [0, 0, 1, 1], [], []>} : vector<8x8xf32>, vector<8x256xf32>, vector<8x256xf32> -> vector<8x256xf32>
    %83 = arith.addf %74, %82 : vector<8x256xf32>
    %c0_48 = arith.constant 0 : index
    %c48 = arith.constant 48 : index
    %84 = vector.load %arg6[%c0_48, %c48] : memref<8x320xf32, #tpu.memory_space<vmem>>, vector<8x256xf32>
    %c7 = arith.constant 7 : index
    %c0_49 = arith.constant 0 : index
    %c0_50 = arith.constant 0 : index
    %85 = vector.load %arg2[%c7, %c0_49, %c0_50] : memref<36x8x8xf32, #tpu.memory_space<vmem>>, vector<1x8x8xf32>
    %86 = vector.shape_cast %85 : vector<1x8x8xf32> to vector<8x8xf32>
    %cst_51 = arith.constant dense<0.000000e+00> : vector<8x256xf32>
    %87 = tpu.matmul %86, %84, %cst_51 {dimension_numbers = #tpu.dot_dimension_numbers<[1], [0], [0], [1], [0, 0, 1, 1], [], []>} : vector<8x8xf32>, vector<8x256xf32>, vector<8x256xf32> -> vector<8x256xf32>
    %88 = arith.addf %83, %87 : vector<8x256xf32>
    %c0_52 = arith.constant 0 : index
    %c49 = arith.constant 49 : index
    %89 = vector.load %arg6[%c0_52, %c49] : memref<8x320xf32, #tpu.memory_space<vmem>>, vector<8x256xf32>
    %cst_53 = arith.constant 0.000000e+00 : f32
    %90 = vector.shape_cast %27 : vector<1x256xi1> to vector<1x256xi1>
    %91 = vector.broadcast %90 : vector<1x256xi1> to vector<8x256xi1>
    %92 = vector.broadcast %cst_53 : f32 to vector<8x256xf32>
    %93 = arith.select %91, %89, %92 : vector<8x256xi1>, vector<8x256xf32>
    %c8 = arith.constant 8 : index
    %c0_54 = arith.constant 0 : index
    %c0_55 = arith.constant 0 : index
    %94 = vector.load %arg2[%c8, %c0_54, %c0_55] : memref<36x8x8xf32, #tpu.memory_space<vmem>>, vector<1x8x8xf32>
    %95 = vector.shape_cast %94 : vector<1x8x8xf32> to vector<8x8xf32>
    %cst_56 = arith.constant dense<0.000000e+00> : vector<8x256xf32>
    %96 = tpu.matmul %95, %93, %cst_56 {dimension_numbers = #tpu.dot_dimension_numbers<[1], [0], [0], [1], [0, 0, 1, 1], [], []>} : vector<8x8xf32>, vector<8x256xf32>, vector<8x256xf32> -> vector<8x256xf32>
    %97 = arith.addf %88, %96 : vector<8x256xf32>
    %c0_57 = arith.constant 0 : index
    %c0_58 = arith.constant 0 : index
    %c0_59 = arith.constant 0 : index
    %98 = vector.load %arg3[%c0_57, %c0_58, %c0_59] : memref<4x8x1xf32, #tpu.memory_space<vmem>>, vector<1x8x1xf32>
    %99 = vector.shape_cast %98 : vector<1x8x1xf32> to vector<8x1xf32>
    %100 = vector.broadcast %99 : vector<8x1xf32> to vector<8x256xf32>
    %101 = arith.mulf %97, %100 : vector<8x256xf32>
    %c0_60 = arith.constant 0 : index
    %c0_61 = arith.constant 0 : index
    %c0_62 = arith.constant 0 : index
    %102 = vector.load %arg4[%c0_60, %c0_61, %c0_62] : memref<4x8x1xf32, #tpu.memory_space<vmem>>, vector<1x8x1xf32>
    %103 = vector.shape_cast %102 : vector<1x8x1xf32> to vector<8x1xf32>
    %104 = vector.broadcast %103 : vector<8x1xf32> to vector<8x256xf32>
    %105 = arith.addf %101, %104 : vector<8x256xf32>
    %c0_63 = arith.constant 0 : index
    %c32_64 = arith.constant 32 : index
    %106 = vector.load %arg7[%c0_63, %c32_64] : memref<8x320xf32, #tpu.memory_space<vmem>>, vector<8x256xf32>
    tpu.vector_store %arg7[%c0_63, %c32_64], %105 {strides = array<i32>} : memref<8x320xf32, #tpu.memory_space<vmem>>, vector<8x256xf32>,
    %cst_65 = arith.constant 0.000000e+00 : f32
    %107 = vector.broadcast %cst_65 : f32 to vector<8x256xf32>
    %c0_66 = arith.constant 0 : index
    %c15_67 = arith.constant 15 : index
    %108 = vector.load %arg7[%c0_66, %c15_67] : memref<8x320xf32, #tpu.memory_space<vmem>>, vector<8x256xf32>
    %cst_68 = arith.constant 0.000000e+00 : f32
    %109 = vector.shape_cast %25 : vector<1x256xi1> to vector<1x256xi1>
    %110 = vector.broadcast %109 : vector<1x256xi1> to vector<8x256xi1>
    %111 = vector.broadcast %cst_68 : f32 to vector<8x256xf32>
    %112 = arith.select %110, %108, %111 : vector<8x256xi1>, vector<8x256xf32>
    %c9 = arith.constant 9 : index
    %c0_69 = arith.constant 0 : index
    %c0_70 = arith.constant 0 : index
    %113 = vector.load %arg2[%c9, %c0_69, %c0_70] : memref<36x8x8xf32, #tpu.memory_space<vmem>>, vector<1x8x8xf32>
    %114 = vector.shape_cast %113 : vector<1x8x8xf32> to vector<8x8xf32>
    %cst_71 = arith.constant dense<0.000000e+00> : vector<8x256xf32>
    %115 = tpu.matmul %114, %112, %cst_71 {dimension_numbers = #tpu.dot_dimension_numbers<[1], [0], [0], [1], [0, 0, 1, 1], [], []>} : vector<8x8xf32>, vector<8x256xf32>, vector<8x256xf32> -> vector<8x256xf32>
    %116 = arith.addf %107, %115 : vector<8x256xf32>
    %c0_72 = arith.constant 0 : index
    %c16_73 = arith.constant 16 : index
    %117 = vector.load %arg7[%c0_72, %c16_73] : memref<8x320xf32, #tpu.memory_space<vmem>>, vector<8x256xf32>
    %c10 = arith.constant 10 : index
    %c0_74 = arith.constant 0 : index
    %c0_75 = arith.constant 0 : index
    %118 = vector.load %arg2[%c10, %c0_74, %c0_75] : memref<36x8x8xf32, #tpu.memory_space<vmem>>, vector<1x8x8xf32>
    %119 = vector.shape_cast %118 : vector<1x8x8xf32> to vector<8x8xf32>
    %cst_76 = arith.constant dense<0.000000e+00> : vector<8x256xf32>
    %120 = tpu.matmul %119, %117, %cst_76 {dimension_numbers = #tpu.dot_dimension_numbers<[1], [0], [0], [1], [0, 0, 1, 1], [], []>} : vector<8x8xf32>, vector<8x256xf32>, vector<8x256xf32> -> vector<8x256xf32>
    %121 = arith.addf %116, %120 : vector<8x256xf32>
    %c0_77 = arith.constant 0 : index
    %c17_78 = arith.constant 17 : index
    %122 = vector.load %arg7[%c0_77, %c17_78] : memref<8x320xf32, #tpu.memory_space<vmem>>, vector<8x256xf32>
    %cst_79 = arith.constant 0.000000e+00 : f32
    %123 = vector.shape_cast %27 : vector<1x256xi1> to vector<1x256xi1>
    %124 = vector.broadcast %123 : vector<1x256xi1> to vector<8x256xi1>
    %125 = vector.broadcast %cst_79 : f32 to vector<8x256xf32>
    %126 = arith.select %124, %122, %125 : vector<8x256xi1>, vector<8x256xf32>
    %c11 = arith.constant 11 : index
    %c0_80 = arith.constant 0 : index
    %c0_81 = arith.constant 0 : index
    %127 = vector.load %arg2[%c11, %c0_80, %c0_81] : memref<36x8x8xf32, #tpu.memory_space<vmem>>, vector<1x8x8xf32>
    %128 = vector.shape_cast %127 : vector<1x8x8xf32> to vector<8x8xf32>
    %cst_82 = arith.constant dense<0.000000e+00> : vector<8x256xf32>
    %129 = tpu.matmul %128, %126, %cst_82 {dimension_numbers = #tpu.dot_dimension_numbers<[1], [0], [0], [1], [0, 0, 1, 1], [], []>} : vector<8x8xf32>, vector<8x256xf32>, vector<8x256xf32> -> vector<8x256xf32>
    %130 = arith.addf %121, %129 : vector<8x256xf32>
    %c0_83 = arith.constant 0 : index
    %c31_84 = arith.constant 31 : index
    %131 = vector.load %arg7[%c0_83, %c31_84] : memref<8x320xf32, #tpu.memory_space<vmem>>, vector<8x256xf32>
    %cst_85 = arith.constant 0.000000e+00 : f32
    %132 = vector.shape_cast %25 : vector<1x256xi1> to vector<1x256xi1>
    %133 = vector.broadcast %132 : vector<1x256xi1> to vector<8x256xi1>
    %134 = vector.broadcast %cst_85 : f32 to vector<8x256xf32>
    %135 = arith.select %133, %131, %134 : vector<8x256xi1>, vector<8x256xf32>
    %c12 = arith.constant 12 : index
    %c0_86 = arith.constant 0 : index
    %c0_87 = arith.constant 0 : index
    %136 = vector.load %arg2[%c12, %c0_86, %c0_87] : memref<36x8x8xf32, #tpu.memory_space<vmem>>, vector<1x8x8xf32>
    %137 = vector.shape_cast %136 : vector<1x8x8xf32> to vector<8x8xf32>
    %cst_88 = arith.constant dense<0.000000e+00> : vector<8x256xf32>
    %138 = tpu.matmul %137, %135, %cst_88 {dimension_numbers = #tpu.dot_dimension_numbers<[1], [0], [0], [1], [0, 0, 1, 1], [], []>} : vector<8x8xf32>, vector<8x256xf32>, vector<8x256xf32> -> vector<8x256xf32>
    %139 = arith.addf %130, %138 : vector<8x256xf32>
    %c0_89 = arith.constant 0 : index
    %c32_90 = arith.constant 32 : index
    %140 = vector.load %arg7[%c0_89, %c32_90] : memref<8x320xf32, #tpu.memory_space<vmem>>, vector<8x256xf32>
    %c13 = arith.constant 13 : index
    %c0_91 = arith.constant 0 : index
    %c0_92 = arith.constant 0 : index
    %141 = vector.load %arg2[%c13, %c0_91, %c0_92] : memref<36x8x8xf32, #tpu.memory_space<vmem>>, vector<1x8x8xf32>
    %142 = vector.shape_cast %141 : vector<1x8x8xf32> to vector<8x8xf32>
    %cst_93 = arith.constant dense<0.000000e+00> : vector<8x256xf32>
    %143 = tpu.matmul %142, %140, %cst_93 {dimension_numbers = #tpu.dot_dimension_numbers<[1], [0], [0], [1], [0, 0, 1, 1], [], []>} : vector<8x8xf32>, vector<8x256xf32>, vector<8x256xf32> -> vector<8x256xf32>
    %144 = arith.addf %139, %143 : vector<8x256xf32>
    %c0_94 = arith.constant 0 : index
    %c33_95 = arith.constant 33 : index
    %145 = vector.load %arg7[%c0_94, %c33_95] : memref<8x320xf32, #tpu.memory_space<vmem>>, vector<8x256xf32>
    %cst_96 = arith.constant 0.000000e+00 : f32
    %146 = vector.shape_cast %27 : vector<1x256xi1> to vector<1x256xi1>
    %147 = vector.broadcast %146 : vector<1x256xi1> to vector<8x256xi1>
    %148 = vector.broadcast %cst_96 : f32 to vector<8x256xf32>
    %149 = arith.select %147, %145, %148 : vector<8x256xi1>, vector<8x256xf32>
    %c14 = arith.constant 14 : index
    %c0_97 = arith.constant 0 : index
    %c0_98 = arith.constant 0 : index
    %150 = vector.load %arg2[%c14, %c0_97, %c0_98] : memref<36x8x8xf32, #tpu.memory_space<vmem>>, vector<1x8x8xf32>
    %151 = vector.shape_cast %150 : vector<1x8x8xf32> to vector<8x8xf32>
    %cst_99 = arith.constant dense<0.000000e+00> : vector<8x256xf32>
    %152 = tpu.matmul %151, %149, %cst_99 {dimension_numbers = #tpu.dot_dimension_numbers<[1], [0], [0], [1], [0, 0, 1, 1], [], []>} : vector<8x8xf32>, vector<8x256xf32>, vector<8x256xf32> -> vector<8x256xf32>
    %153 = arith.addf %144, %152 : vector<8x256xf32>
    %c0_100 = arith.constant 0 : index
    %c47_101 = arith.constant 47 : index
    %154 = vector.load %arg7[%c0_100, %c47_101] : memref<8x320xf32, #tpu.memory_space<vmem>>, vector<8x256xf32>
    %cst_102 = arith.constant 0.000000e+00 : f32
    %155 = vector.shape_cast %25 : vector<1x256xi1> to vector<1x256xi1>
    %156 = vector.broadcast %155 : vector<1x256xi1> to vector<8x256xi1>
    %157 = vector.broadcast %cst_102 : f32 to vector<8x256xf32>
    %158 = arith.select %156, %154, %157 : vector<8x256xi1>, vector<8x256xf32>
    %c15_103 = arith.constant 15 : index
    %c0_104 = arith.constant 0 : index
    %c0_105 = arith.constant 0 : index
    %159 = vector.load %arg2[%c15_103, %c0_104, %c0_105] : memref<36x8x8xf32, #tpu.memory_space<vmem>>, vector<1x8x8xf32>
    %160 = vector.shape_cast %159 : vector<1x8x8xf32> to vector<8x8xf32>
    %cst_106 = arith.constant dense<0.000000e+00> : vector<8x256xf32>
    %161 = tpu.matmul %160, %158, %cst_106 {dimension_numbers = #tpu.dot_dimension_numbers<[1], [0], [0], [1], [0, 0, 1, 1], [], []>} : vector<8x8xf32>, vector<8x256xf32>, vector<8x256xf32> -> vector<8x256xf32>
    %162 = arith.addf %153, %161 : vector<8x256xf32>
    %c0_107 = arith.constant 0 : index
    %c48_108 = arith.constant 48 : index
    %163 = vector.load %arg7[%c0_107, %c48_108] : memref<8x320xf32, #tpu.memory_space<vmem>>, vector<8x256xf32>
    %c16_109 = arith.constant 16 : index
    %c0_110 = arith.constant 0 : index
    %c0_111 = arith.constant 0 : index
    %164 = vector.load %arg2[%c16_109, %c0_110, %c0_111] : memref<36x8x8xf32, #tpu.memory_space<vmem>>, vector<1x8x8xf32>
    %165 = vector.shape_cast %164 : vector<1x8x8xf32> to vector<8x8xf32>
    %cst_112 = arith.constant dense<0.000000e+00> : vector<8x256xf32>
    %166 = tpu.matmul %165, %163, %cst_112 {dimension_numbers = #tpu.dot_dimension_numbers<[1], [0], [0], [1], [0, 0, 1, 1], [], []>} : vector<8x8xf32>, vector<8x256xf32>, vector<8x256xf32> -> vector<8x256xf32>
    %167 = arith.addf %162, %166 : vector<8x256xf32>
    %c0_113 = arith.constant 0 : index
    %c49_114 = arith.constant 49 : index
    %168 = vector.load %arg7[%c0_113, %c49_114] : memref<8x320xf32, #tpu.memory_space<vmem>>, vector<8x256xf32>
    %cst_115 = arith.constant 0.000000e+00 : f32
    %169 = vector.shape_cast %27 : vector<1x256xi1> to vector<1x256xi1>
    %170 = vector.broadcast %169 : vector<1x256xi1> to vector<8x256xi1>
    %171 = vector.broadcast %cst_115 : f32 to vector<8x256xf32>
    %172 = arith.select %170, %168, %171 : vector<8x256xi1>, vector<8x256xf32>
    %c17_116 = arith.constant 17 : index
    %c0_117 = arith.constant 0 : index
    %c0_118 = arith.constant 0 : index
    %173 = vector.load %arg2[%c17_116, %c0_117, %c0_118] : memref<36x8x8xf32, #tpu.memory_space<vmem>>, vector<1x8x8xf32>
    %174 = vector.shape_cast %173 : vector<1x8x8xf32> to vector<8x8xf32>
    %cst_119 = arith.constant dense<0.000000e+00> : vector<8x256xf32>
    %175 = tpu.matmul %174, %172, %cst_119 {dimension_numbers = #tpu.dot_dimension_numbers<[1], [0], [0], [1], [0, 0, 1, 1], [], []>} : vector<8x8xf32>, vector<8x256xf32>, vector<8x256xf32> -> vector<8x256xf32>
    %176 = arith.addf %167, %175 : vector<8x256xf32>
    %c1_120 = arith.constant 1 : index
    %c0_121 = arith.constant 0 : index
    %c0_122 = arith.constant 0 : index
    %177 = vector.load %arg3[%c1_120, %c0_121, %c0_122] : memref<4x8x1xf32, #tpu.memory_space<vmem>>, vector<1x8x1xf32>
    %178 = vector.shape_cast %177 : vector<1x8x1xf32> to vector<8x1xf32>
    %179 = vector.broadcast %178 : vector<8x1xf32> to vector<8x256xf32>
    %180 = arith.mulf %176, %179 : vector<8x256xf32>
    %c1_123 = arith.constant 1 : index
    %c0_124 = arith.constant 0 : index
    %c0_125 = arith.constant 0 : index
    %181 = vector.load %arg4[%c1_123, %c0_124, %c0_125] : memref<4x8x1xf32, #tpu.memory_space<vmem>>, vector<1x8x1xf32>
    %182 = vector.shape_cast %181 : vector<1x8x1xf32> to vector<8x1xf32>
    %183 = vector.broadcast %182 : vector<8x1xf32> to vector<8x256xf32>
    %184 = arith.addf %180, %183 : vector<8x256xf32>
    %c0_126 = arith.constant 0 : index
    %c32_127 = arith.constant 32 : index
    %185 = vector.load %arg6[%c0_126, %c32_127] : memref<8x320xf32, #tpu.memory_space<vmem>>, vector<8x256xf32>
    tpu.vector_store %arg6[%c0_126, %c32_127], %184 {strides = array<i32>} : memref<8x320xf32, #tpu.memory_space<vmem>>, vector<8x256xf32>,
    %cst_128 = arith.constant 0.000000e+00 : f32
    %186 = vector.broadcast %cst_128 : f32 to vector<8x256xf32>
    %c0_129 = arith.constant 0 : index
    %c15_130 = arith.constant 15 : index
    %187 = vector.load %arg6[%c0_129, %c15_130] : memref<8x320xf32, #tpu.memory_space<vmem>>, vector<8x256xf32>
    %cst_131 = arith.constant 0.000000e+00 : f32
    %188 = vector.shape_cast %25 : vector<1x256xi1> to vector<1x256xi1>
    %189 = vector.broadcast %188 : vector<1x256xi1> to vector<8x256xi1>
    %190 = vector.broadcast %cst_131 : f32 to vector<8x256xf32>
    %191 = arith.select %189, %187, %190 : vector<8x256xi1>, vector<8x256xf32>
    %c18 = arith.constant 18 : index
    %c0_132 = arith.constant 0 : index
    %c0_133 = arith.constant 0 : index
    %192 = vector.load %arg2[%c18, %c0_132, %c0_133] : memref<36x8x8xf32, #tpu.memory_space<vmem>>, vector<1x8x8xf32>
    %193 = vector.shape_cast %192 : vector<1x8x8xf32> to vector<8x8xf32>
    %cst_134 = arith.constant dense<0.000000e+00> : vector<8x256xf32>
    %194 = tpu.matmul %193, %191, %cst_134 {dimension_numbers = #tpu.dot_dimension_numbers<[1], [0], [0], [1], [0, 0, 1, 1], [], []>} : vector<8x8xf32>, vector<8x256xf32>, vector<8x256xf32> -> vector<8x256xf32>
    %195 = arith.addf %186, %194 : vector<8x256xf32>
    %c0_135 = arith.constant 0 : index
    %c16_136 = arith.constant 16 : index
    %196 = vector.load %arg6[%c0_135, %c16_136] : memref<8x320xf32, #tpu.memory_space<vmem>>, vector<8x256xf32>
    %c19 = arith.constant 19 : index
    %c0_137 = arith.constant 0 : index
    %c0_138 = arith.constant 0 : index
    %197 = vector.load %arg2[%c19, %c0_137, %c0_138] : memref<36x8x8xf32, #tpu.memory_space<vmem>>, vector<1x8x8xf32>
    %198 = vector.shape_cast %197 : vector<1x8x8xf32> to vector<8x8xf32>
    %cst_139 = arith.constant dense<0.000000e+00> : vector<8x256xf32>
    %199 = tpu.matmul %198, %196, %cst_139 {dimension_numbers = #tpu.dot_dimension_numbers<[1], [0], [0], [1], [0, 0, 1, 1], [], []>} : vector<8x8xf32>, vector<8x256xf32>, vector<8x256xf32> -> vector<8x256xf32>
    %200 = arith.addf %195, %199 : vector<8x256xf32>
    %c0_140 = arith.constant 0 : index
    %c17_141 = arith.constant 17 : index
    %201 = vector.load %arg6[%c0_140, %c17_141] : memref<8x320xf32, #tpu.memory_space<vmem>>, vector<8x256xf32>
    %cst_142 = arith.constant 0.000000e+00 : f32
    %202 = vector.shape_cast %27 : vector<1x256xi1> to vector<1x256xi1>
    %203 = vector.broadcast %202 : vector<1x256xi1> to vector<8x256xi1>
    %204 = vector.broadcast %cst_142 : f32 to vector<8x256xf32>
    %205 = arith.select %203, %201, %204 : vector<8x256xi1>, vector<8x256xf32>
    %c20 = arith.constant 20 : index
    %c0_143 = arith.constant 0 : index
    %c0_144 = arith.constant 0 : index
    %206 = vector.load %arg2[%c20, %c0_143, %c0_144] : memref<36x8x8xf32, #tpu.memory_space<vmem>>, vector<1x8x8xf32>
    %207 = vector.shape_cast %206 : vector<1x8x8xf32> to vector<8x8xf32>
    %cst_145 = arith.constant dense<0.000000e+00> : vector<8x256xf32>
    %208 = tpu.matmul %207, %205, %cst_145 {dimension_numbers = #tpu.dot_dimension_numbers<[1], [0], [0], [1], [0, 0, 1, 1], [], []>} : vector<8x8xf32>, vector<8x256xf32>, vector<8x256xf32> -> vector<8x256xf32>
    %209 = arith.addf %200, %208 : vector<8x256xf32>
    %c0_146 = arith.constant 0 : index
    %c31_147 = arith.constant 31 : index
    %210 = vector.load %arg6[%c0_146, %c31_147] : memref<8x320xf32, #tpu.memory_space<vmem>>, vector<8x256xf32>
    %cst_148 = arith.constant 0.000000e+00 : f32
    %211 = vector.shape_cast %25 : vector<1x256xi1> to vector<1x256xi1>
    %212 = vector.broadcast %211 : vector<1x256xi1> to vector<8x256xi1>
    %213 = vector.broadcast %cst_148 : f32 to vector<8x256xf32>
    %214 = arith.select %212, %210, %213 : vector<8x256xi1>, vector<8x256xf32>
    %c21 = arith.constant 21 : index
    %c0_149 = arith.constant 0 : index
    %c0_150 = arith.constant 0 : index
    %215 = vector.load %arg2[%c21, %c0_149, %c0_150] : memref<36x8x8xf32, #tpu.memory_space<vmem>>, vector<1x8x8xf32>
    %216 = vector.shape_cast %215 : vector<1x8x8xf32> to vector<8x8xf32>
    %cst_151 = arith.constant dense<0.000000e+00> : vector<8x256xf32>
    %217 = tpu.matmul %216, %214, %cst_151 {dimension_numbers = #tpu.dot_dimension_numbers<[1], [0], [0], [1], [0, 0, 1, 1], [], []>} : vector<8x8xf32>, vector<8x256xf32>, vector<8x256xf32> -> vector<8x256xf32>
    %218 = arith.addf %209, %217 : vector<8x256xf32>
    %c0_152 = arith.constant 0 : index
    %c32_153 = arith.constant 32 : index
    %219 = vector.load %arg6[%c0_152, %c32_153] : memref<8x320xf32, #tpu.memory_space<vmem>>, vector<8x256xf32>
    %c22 = arith.constant 22 : index
    %c0_154 = arith.constant 0 : index
    %c0_155 = arith.constant 0 : index
    %220 = vector.load %arg2[%c22, %c0_154, %c0_155] : memref<36x8x8xf32, #tpu.memory_space<vmem>>, vector<1x8x8xf32>
    %221 = vector.shape_cast %220 : vector<1x8x8xf32> to vector<8x8xf32>
    %cst_156 = arith.constant dense<0.000000e+00> : vector<8x256xf32>
    %222 = tpu.matmul %221, %219, %cst_156 {dimension_numbers = #tpu.dot_dimension_numbers<[1], [0], [0], [1], [0, 0, 1, 1], [], []>} : vector<8x8xf32>, vector<8x256xf32>, vector<8x256xf32> -> vector<8x256xf32>
    %223 = arith.addf %218, %222 : vector<8x256xf32>
    %c0_157 = arith.constant 0 : index
    %c33_158 = arith.constant 33 : index
    %224 = vector.load %arg6[%c0_157, %c33_158] : memref<8x320xf32, #tpu.memory_space<vmem>>, vector<8x256xf32>
    %cst_159 = arith.constant 0.000000e+00 : f32
    %225 = vector.shape_cast %27 : vector<1x256xi1> to vector<1x256xi1>
    %226 = vector.broadcast %225 : vector<1x256xi1> to vector<8x256xi1>
    %227 = vector.broadcast %cst_159 : f32 to vector<8x256xf32>
    %228 = arith.select %226, %224, %227 : vector<8x256xi1>, vector<8x256xf32>
    %c23 = arith.constant 23 : index
    %c0_160 = arith.constant 0 : index
    %c0_161 = arith.constant 0 : index
    %229 = vector.load %arg2[%c23, %c0_160, %c0_161] : memref<36x8x8xf32, #tpu.memory_space<vmem>>, vector<1x8x8xf32>
    %230 = vector.shape_cast %229 : vector<1x8x8xf32> to vector<8x8xf32>
    %cst_162 = arith.constant dense<0.000000e+00> : vector<8x256xf32>
    %231 = tpu.matmul %230, %228, %cst_162 {dimension_numbers = #tpu.dot_dimension_numbers<[1], [0], [0], [1], [0, 0, 1, 1], [], []>} : vector<8x8xf32>, vector<8x256xf32>, vector<8x256xf32> -> vector<8x256xf32>
    %232 = arith.addf %223, %231 : vector<8x256xf32>
    %c0_163 = arith.constant 0 : index
    %c47_164 = arith.constant 47 : index
    %233 = vector.load %arg6[%c0_163, %c47_164] : memref<8x320xf32, #tpu.memory_space<vmem>>, vector<8x256xf32>
    %cst_165 = arith.constant 0.000000e+00 : f32
    %234 = vector.shape_cast %25 : vector<1x256xi1> to vector<1x256xi1>
    %235 = vector.broadcast %234 : vector<1x256xi1> to vector<8x256xi1>
    %236 = vector.broadcast %cst_165 : f32 to vector<8x256xf32>
    %237 = arith.select %235, %233, %236 : vector<8x256xi1>, vector<8x256xf32>
    %c24 = arith.constant 24 : index
    %c0_166 = arith.constant 0 : index
    %c0_167 = arith.constant 0 : index
    %238 = vector.load %arg2[%c24, %c0_166, %c0_167] : memref<36x8x8xf32, #tpu.memory_space<vmem>>, vector<1x8x8xf32>
    %239 = vector.shape_cast %238 : vector<1x8x8xf32> to vector<8x8xf32>
    %cst_168 = arith.constant dense<0.000000e+00> : vector<8x256xf32>
    %240 = tpu.matmul %239, %237, %cst_168 {dimension_numbers = #tpu.dot_dimension_numbers<[1], [0], [0], [1], [0, 0, 1, 1], [], []>} : vector<8x8xf32>, vector<8x256xf32>, vector<8x256xf32> -> vector<8x256xf32>
    %241 = arith.addf %232, %240 : vector<8x256xf32>
    %c0_169 = arith.constant 0 : index
    %c48_170 = arith.constant 48 : index
    %242 = vector.load %arg6[%c0_169, %c48_170] : memref<8x320xf32, #tpu.memory_space<vmem>>, vector<8x256xf32>
    %c25 = arith.constant 25 : index
    %c0_171 = arith.constant 0 : index
    %c0_172 = arith.constant 0 : index
    %243 = vector.load %arg2[%c25, %c0_171, %c0_172] : memref<36x8x8xf32, #tpu.memory_space<vmem>>, vector<1x8x8xf32>
    %244 = vector.shape_cast %243 : vector<1x8x8xf32> to vector<8x8xf32>
    %cst_173 = arith.constant dense<0.000000e+00> : vector<8x256xf32>
    %245 = tpu.matmul %244, %242, %cst_173 {dimension_numbers = #tpu.dot_dimension_numbers<[1], [0], [0], [1], [0, 0, 1, 1], [], []>} : vector<8x8xf32>, vector<8x256xf32>, vector<8x256xf32> -> vector<8x256xf32>
    %246 = arith.addf %241, %245 : vector<8x256xf32>
    %c0_174 = arith.constant 0 : index
    %c49_175 = arith.constant 49 : index
    %247 = vector.load %arg6[%c0_174, %c49_175] : memref<8x320xf32, #tpu.memory_space<vmem>>, vector<8x256xf32>
    %cst_176 = arith.constant 0.000000e+00 : f32
    %248 = vector.shape_cast %27 : vector<1x256xi1> to vector<1x256xi1>
    %249 = vector.broadcast %248 : vector<1x256xi1> to vector<8x256xi1>
    %250 = vector.broadcast %cst_176 : f32 to vector<8x256xf32>
    %251 = arith.select %249, %247, %250 : vector<8x256xi1>, vector<8x256xf32>
    %c26 = arith.constant 26 : index
    %c0_177 = arith.constant 0 : index
    %c0_178 = arith.constant 0 : index
    %252 = vector.load %arg2[%c26, %c0_177, %c0_178] : memref<36x8x8xf32, #tpu.memory_space<vmem>>, vector<1x8x8xf32>
    %253 = vector.shape_cast %252 : vector<1x8x8xf32> to vector<8x8xf32>
    %cst_179 = arith.constant dense<0.000000e+00> : vector<8x256xf32>
    %254 = tpu.matmul %253, %251, %cst_179 {dimension_numbers = #tpu.dot_dimension_numbers<[1], [0], [0], [1], [0, 0, 1, 1], [], []>} : vector<8x8xf32>, vector<8x256xf32>, vector<8x256xf32> -> vector<8x256xf32>
    %255 = arith.addf %246, %254 : vector<8x256xf32>
    %c2_180 = arith.constant 2 : index
    %c0_181 = arith.constant 0 : index
    %c0_182 = arith.constant 0 : index
    %256 = vector.load %arg3[%c2_180, %c0_181, %c0_182] : memref<4x8x1xf32, #tpu.memory_space<vmem>>, vector<1x8x1xf32>
    %257 = vector.shape_cast %256 : vector<1x8x1xf32> to vector<8x1xf32>
    %258 = vector.broadcast %257 : vector<8x1xf32> to vector<8x256xf32>
    %259 = arith.mulf %255, %258 : vector<8x256xf32>
    %c2_183 = arith.constant 2 : index
    %c0_184 = arith.constant 0 : index
    %c0_185 = arith.constant 0 : index
    %260 = vector.load %arg4[%c2_183, %c0_184, %c0_185] : memref<4x8x1xf32, #tpu.memory_space<vmem>>, vector<1x8x1xf32>
    %261 = vector.shape_cast %260 : vector<1x8x1xf32> to vector<8x1xf32>
    %262 = vector.broadcast %261 : vector<8x1xf32> to vector<8x256xf32>
    %263 = arith.addf %259, %262 : vector<8x256xf32>
    %c0_186 = arith.constant 0 : index
    %c32_187 = arith.constant 32 : index
    %264 = vector.load %arg7[%c0_186, %c32_187] : memref<8x320xf32, #tpu.memory_space<vmem>>, vector<8x256xf32>
    tpu.vector_store %arg7[%c0_186, %c32_187], %263 {strides = array<i32>} : memref<8x320xf32, #tpu.memory_space<vmem>>, vector<8x256xf32>,
    %cst_188 = arith.constant 0.000000e+00 : f32
    %265 = vector.broadcast %cst_188 : f32 to vector<8x256xf32>
    %c0_189 = arith.constant 0 : index
    %c15_190 = arith.constant 15 : index
    %266 = vector.load %arg7[%c0_189, %c15_190] : memref<8x320xf32, #tpu.memory_space<vmem>>, vector<8x256xf32>
    %cst_191 = arith.constant 0.000000e+00 : f32
    %267 = vector.shape_cast %25 : vector<1x256xi1> to vector<1x256xi1>
    %268 = vector.broadcast %267 : vector<1x256xi1> to vector<8x256xi1>
    %269 = vector.broadcast %cst_191 : f32 to vector<8x256xf32>
    %270 = arith.select %268, %266, %269 : vector<8x256xi1>, vector<8x256xf32>
    %c27 = arith.constant 27 : index
    %c0_192 = arith.constant 0 : index
    %c0_193 = arith.constant 0 : index
    %271 = vector.load %arg2[%c27, %c0_192, %c0_193] : memref<36x8x8xf32, #tpu.memory_space<vmem>>, vector<1x8x8xf32>
    %272 = vector.shape_cast %271 : vector<1x8x8xf32> to vector<8x8xf32>
    %cst_194 = arith.constant dense<0.000000e+00> : vector<8x256xf32>
    %273 = tpu.matmul %272, %270, %cst_194 {dimension_numbers = #tpu.dot_dimension_numbers<[1], [0], [0], [1], [0, 0, 1, 1], [], []>} : vector<8x8xf32>, vector<8x256xf32>, vector<8x256xf32> -> vector<8x256xf32>
    %274 = arith.addf %265, %273 : vector<8x256xf32>
    %c0_195 = arith.constant 0 : index
    %c16_196 = arith.constant 16 : index
    %275 = vector.load %arg7[%c0_195, %c16_196] : memref<8x320xf32, #tpu.memory_space<vmem>>, vector<8x256xf32>
    %c28 = arith.constant 28 : index
    %c0_197 = arith.constant 0 : index
    %c0_198 = arith.constant 0 : index
    %276 = vector.load %arg2[%c28, %c0_197, %c0_198] : memref<36x8x8xf32, #tpu.memory_space<vmem>>, vector<1x8x8xf32>
    %277 = vector.shape_cast %276 : vector<1x8x8xf32> to vector<8x8xf32>
    %cst_199 = arith.constant dense<0.000000e+00> : vector<8x256xf32>
    %278 = tpu.matmul %277, %275, %cst_199 {dimension_numbers = #tpu.dot_dimension_numbers<[1], [0], [0], [1], [0, 0, 1, 1], [], []>} : vector<8x8xf32>, vector<8x256xf32>, vector<8x256xf32> -> vector<8x256xf32>
    %279 = arith.addf %274, %278 : vector<8x256xf32>
    %c0_200 = arith.constant 0 : index
    %c17_201 = arith.constant 17 : index
    %280 = vector.load %arg7[%c0_200, %c17_201] : memref<8x320xf32, #tpu.memory_space<vmem>>, vector<8x256xf32>
    %cst_202 = arith.constant 0.000000e+00 : f32
    %281 = vector.shape_cast %27 : vector<1x256xi1> to vector<1x256xi1>
    %282 = vector.broadcast %281 : vector<1x256xi1> to vector<8x256xi1>
    %283 = vector.broadcast %cst_202 : f32 to vector<8x256xf32>
    %284 = arith.select %282, %280, %283 : vector<8x256xi1>, vector<8x256xf32>
    %c29 = arith.constant 29 : index
    %c0_203 = arith.constant 0 : index
    %c0_204 = arith.constant 0 : index
    %285 = vector.load %arg2[%c29, %c0_203, %c0_204] : memref<36x8x8xf32, #tpu.memory_space<vmem>>, vector<1x8x8xf32>
    %286 = vector.shape_cast %285 : vector<1x8x8xf32> to vector<8x8xf32>
    %cst_205 = arith.constant dense<0.000000e+00> : vector<8x256xf32>
    %287 = tpu.matmul %286, %284, %cst_205 {dimension_numbers = #tpu.dot_dimension_numbers<[1], [0], [0], [1], [0, 0, 1, 1], [], []>} : vector<8x8xf32>, vector<8x256xf32>, vector<8x256xf32> -> vector<8x256xf32>
    %288 = arith.addf %279, %287 : vector<8x256xf32>
    %c0_206 = arith.constant 0 : index
    %c31_207 = arith.constant 31 : index
    %289 = vector.load %arg7[%c0_206, %c31_207] : memref<8x320xf32, #tpu.memory_space<vmem>>, vector<8x256xf32>
    %cst_208 = arith.constant 0.000000e+00 : f32
    %290 = vector.shape_cast %25 : vector<1x256xi1> to vector<1x256xi1>
    %291 = vector.broadcast %290 : vector<1x256xi1> to vector<8x256xi1>
    %292 = vector.broadcast %cst_208 : f32 to vector<8x256xf32>
    %293 = arith.select %291, %289, %292 : vector<8x256xi1>, vector<8x256xf32>
    %c30 = arith.constant 30 : index
    %c0_209 = arith.constant 0 : index
    %c0_210 = arith.constant 0 : index
    %294 = vector.load %arg2[%c30, %c0_209, %c0_210] : memref<36x8x8xf32, #tpu.memory_space<vmem>>, vector<1x8x8xf32>
    %295 = vector.shape_cast %294 : vector<1x8x8xf32> to vector<8x8xf32>
    %cst_211 = arith.constant dense<0.000000e+00> : vector<8x256xf32>
    %296 = tpu.matmul %295, %293, %cst_211 {dimension_numbers = #tpu.dot_dimension_numbers<[1], [0], [0], [1], [0, 0, 1, 1], [], []>} : vector<8x8xf32>, vector<8x256xf32>, vector<8x256xf32> -> vector<8x256xf32>
    %297 = arith.addf %288, %296 : vector<8x256xf32>
    %c0_212 = arith.constant 0 : index
    %c32_213 = arith.constant 32 : index
    %298 = vector.load %arg7[%c0_212, %c32_213] : memref<8x320xf32, #tpu.memory_space<vmem>>, vector<8x256xf32>
    %c31_214 = arith.constant 31 : index
    %c0_215 = arith.constant 0 : index
    %c0_216 = arith.constant 0 : index
    %299 = vector.load %arg2[%c31_214, %c0_215, %c0_216] : memref<36x8x8xf32, #tpu.memory_space<vmem>>, vector<1x8x8xf32>
    %300 = vector.shape_cast %299 : vector<1x8x8xf32> to vector<8x8xf32>
    %cst_217 = arith.constant dense<0.000000e+00> : vector<8x256xf32>
    %301 = tpu.matmul %300, %298, %cst_217 {dimension_numbers = #tpu.dot_dimension_numbers<[1], [0], [0], [1], [0, 0, 1, 1], [], []>} : vector<8x8xf32>, vector<8x256xf32>, vector<8x256xf32> -> vector<8x256xf32>
    %302 = arith.addf %297, %301 : vector<8x256xf32>
    %c0_218 = arith.constant 0 : index
    %c33_219 = arith.constant 33 : index
    %303 = vector.load %arg7[%c0_218, %c33_219] : memref<8x320xf32, #tpu.memory_space<vmem>>, vector<8x256xf32>
    %cst_220 = arith.constant 0.000000e+00 : f32
    %304 = vector.shape_cast %27 : vector<1x256xi1> to vector<1x256xi1>
    %305 = vector.broadcast %304 : vector<1x256xi1> to vector<8x256xi1>
    %306 = vector.broadcast %cst_220 : f32 to vector<8x256xf32>
    %307 = arith.select %305, %303, %306 : vector<8x256xi1>, vector<8x256xf32>
    %c32_221 = arith.constant 32 : index
    %c0_222 = arith.constant 0 : index
    %c0_223 = arith.constant 0 : index
    %308 = vector.load %arg2[%c32_221, %c0_222, %c0_223] : memref<36x8x8xf32, #tpu.memory_space<vmem>>, vector<1x8x8xf32>
    %309 = vector.shape_cast %308 : vector<1x8x8xf32> to vector<8x8xf32>
    %cst_224 = arith.constant dense<0.000000e+00> : vector<8x256xf32>
    %310 = tpu.matmul %309, %307, %cst_224 {dimension_numbers = #tpu.dot_dimension_numbers<[1], [0], [0], [1], [0, 0, 1, 1], [], []>} : vector<8x8xf32>, vector<8x256xf32>, vector<8x256xf32> -> vector<8x256xf32>
    %311 = arith.addf %302, %310 : vector<8x256xf32>
    %c0_225 = arith.constant 0 : index
    %c47_226 = arith.constant 47 : index
    %312 = vector.load %arg7[%c0_225, %c47_226] : memref<8x320xf32, #tpu.memory_space<vmem>>, vector<8x256xf32>
    %cst_227 = arith.constant 0.000000e+00 : f32
    %313 = vector.shape_cast %25 : vector<1x256xi1> to vector<1x256xi1>
    %314 = vector.broadcast %313 : vector<1x256xi1> to vector<8x256xi1>
    %315 = vector.broadcast %cst_227 : f32 to vector<8x256xf32>
    %316 = arith.select %314, %312, %315 : vector<8x256xi1>, vector<8x256xf32>
    %c33_228 = arith.constant 33 : index
    %c0_229 = arith.constant 0 : index
    %c0_230 = arith.constant 0 : index
    %317 = vector.load %arg2[%c33_228, %c0_229, %c0_230] : memref<36x8x8xf32, #tpu.memory_space<vmem>>, vector<1x8x8xf32>
    %318 = vector.shape_cast %317 : vector<1x8x8xf32> to vector<8x8xf32>
    %cst_231 = arith.constant dense<0.000000e+00> : vector<8x256xf32>
    %319 = tpu.matmul %318, %316, %cst_231 {dimension_numbers = #tpu.dot_dimension_numbers<[1], [0], [0], [1], [0, 0, 1, 1], [], []>} : vector<8x8xf32>, vector<8x256xf32>, vector<8x256xf32> -> vector<8x256xf32>
    %320 = arith.addf %311, %319 : vector<8x256xf32>
    %c0_232 = arith.constant 0 : index
    %c48_233 = arith.constant 48 : index
    %321 = vector.load %arg7[%c0_232, %c48_233] : memref<8x320xf32, #tpu.memory_space<vmem>>, vector<8x256xf32>
    %c34 = arith.constant 34 : index
    %c0_234 = arith.constant 0 : index
    %c0_235 = arith.constant 0 : index
    %322 = vector.load %arg2[%c34, %c0_234, %c0_235] : memref<36x8x8xf32, #tpu.memory_space<vmem>>, vector<1x8x8xf32>
    %323 = vector.shape_cast %322 : vector<1x8x8xf32> to vector<8x8xf32>
    %cst_236 = arith.constant dense<0.000000e+00> : vector<8x256xf32>
    %324 = tpu.matmul %323, %321, %cst_236 {dimension_numbers = #tpu.dot_dimension_numbers<[1], [0], [0], [1], [0, 0, 1, 1], [], []>} : vector<8x8xf32>, vector<8x256xf32>, vector<8x256xf32> -> vector<8x256xf32>
    %325 = arith.addf %320, %324 : vector<8x256xf32>
    %c0_237 = arith.constant 0 : index
    %c49_238 = arith.constant 49 : index
    %326 = vector.load %arg7[%c0_237, %c49_238] : memref<8x320xf32, #tpu.memory_space<vmem>>, vector<8x256xf32>
    %cst_239 = arith.constant 0.000000e+00 : f32
    %327 = vector.shape_cast %27 : vector<1x256xi1> to vector<1x256xi1>
    %328 = vector.broadcast %327 : vector<1x256xi1> to vector<8x256xi1>
    %329 = vector.broadcast %cst_239 : f32 to vector<8x256xf32>
    %330 = arith.select %328, %326, %329 : vector<8x256xi1>, vector<8x256xf32>
    %c35 = arith.constant 35 : index
    %c0_240 = arith.constant 0 : index
    %c0_241 = arith.constant 0 : index
    %331 = vector.load %arg2[%c35, %c0_240, %c0_241] : memref<36x8x8xf32, #tpu.memory_space<vmem>>, vector<1x8x8xf32>
    %332 = vector.shape_cast %331 : vector<1x8x8xf32> to vector<8x8xf32>
    %cst_242 = arith.constant dense<0.000000e+00> : vector<8x256xf32>
    %333 = tpu.matmul %332, %330, %cst_242 {dimension_numbers = #tpu.dot_dimension_numbers<[1], [0], [0], [1], [0, 0, 1, 1], [], []>} : vector<8x8xf32>, vector<8x256xf32>, vector<8x256xf32> -> vector<8x256xf32>
    %334 = arith.addf %325, %333 : vector<8x256xf32>
    %c3_243 = arith.constant 3 : index
    %c0_244 = arith.constant 0 : index
    %c0_245 = arith.constant 0 : index
    %335 = vector.load %arg3[%c3_243, %c0_244, %c0_245] : memref<4x8x1xf32, #tpu.memory_space<vmem>>, vector<1x8x1xf32>
    %336 = vector.shape_cast %335 : vector<1x8x1xf32> to vector<8x1xf32>
    %337 = vector.broadcast %336 : vector<8x1xf32> to vector<8x256xf32>
    %338 = arith.mulf %334, %337 : vector<8x256xf32>
    %c3_246 = arith.constant 3 : index
    %c0_247 = arith.constant 0 : index
    %c0_248 = arith.constant 0 : index
    %339 = vector.load %arg4[%c3_246, %c0_247, %c0_248] : memref<4x8x1xf32, #tpu.memory_space<vmem>>, vector<1x8x1xf32>
    %340 = vector.shape_cast %339 : vector<1x8x1xf32> to vector<8x1xf32>
    %341 = vector.broadcast %340 : vector<8x1xf32> to vector<8x256xf32>
    %342 = arith.addf %338, %341 : vector<8x256xf32>
    %cst_249 = arith.constant 0.000000e+00 : f32
    %343 = vector.broadcast %cst_249 : f32 to vector<8x256xf32>
    %344 = arith.maximumf %342, %343 : vector<8x256xf32>
    %c0_250 = arith.constant 0 : index
    %c0_251 = arith.constant 0 : index
    %c0_252 = arith.constant 0 : index
    %345 = vector.load %arg5[%c0_250, %c0_251, %c0_252] : memref<1x8x256xf32, #tpu.memory_space<vmem>>, vector<1x8x256xf32>
    %346 = vector.shape_cast %345 : vector<1x8x256xf32> to vector<8x256xf32>
    %347 = vector.shape_cast %344 : vector<8x256xf32> to vector<1x8x256xf32>
    tpu.vector_store %arg5[%c0_250, %c0_251, %c0_252], %347 {strides = array<i32>} : memref<1x8x256xf32, #tpu.memory_space<vmem>>, vector<1x8x256xf32>,
    return
  }
  func.func @transform_0(%arg0: i32) -> (i32, i32, i32) {
    %c0_i32 = arith.constant 0 : i32
    %c0_i32_0 = arith.constant 0 : i32
    %c0_i32_1 = arith.constant 0 : i32
    return %arg0, %c0_i32, %c0_i32_0 : i32, i32, i32
  }
  func.func @transform_1(%arg0: i32) -> (i32, i32, i32) {
    %c0_i32 = arith.constant 0 : i32
    %c0_i32_0 = arith.constant 0 : i32
    %c0_i32_1 = arith.constant 0 : i32
    %c0_i32_2 = arith.constant 0 : i32
    return %c0_i32, %c0_i32_0, %c0_i32_1 : i32, i32, i32
  }
  func.func @transform_2(%arg0: i32) -> (i32, i32, i32) {
    %c0_i32 = arith.constant 0 : i32
    %c0_i32_0 = arith.constant 0 : i32
    %c0_i32_1 = arith.constant 0 : i32
    %c0_i32_2 = arith.constant 0 : i32
    return %c0_i32, %c0_i32_0, %c0_i32_1 : i32, i32, i32
  }
  func.func @transform_3(%arg0: i32) -> (i32, i32, i32) {
    %c0_i32 = arith.constant 0 : i32
    %c0_i32_0 = arith.constant 0 : i32
    %c0_i32_1 = arith.constant 0 : i32
    %c0_i32_2 = arith.constant 0 : i32
    return %c0_i32, %c0_i32_0, %c0_i32_1 : i32, i32, i32
  }
  func.func @transform_4(%arg0: i32) -> (i32, i32, i32) {
    %c0_i32 = arith.constant 0 : i32
    %c0_i32_0 = arith.constant 0 : i32
    %c0_i32_1 = arith.constant 0 : i32
    return %arg0, %c0_i32, %c0_i32_0 : i32, i32, i32
  }
}

</mosaic_0001>

<bundles_post_ra>
// kernel: tpu_custom_call.1
= control target key start
LH: loop header
LB: loop body
LE: loop exit
PB: predicated region body
PF: predicated region fallthrough
CT: control target
= control target key end

     0   :  { %9 = vsyncpa [#allocation5], 0  ;;  %s4658_s0 = inlined_call_operand.vmem [shape: f32[2,4,256], index: 0, kind: input, shape index: {}]   ;;  %s4659_s1 = inlined_call_operand.vmem [shape: f32[36,8,8], index: 1, kind: input, shape index: {}]   ;;  %s4660_s2 = inlined_call_operand.vmem [shape: f32[4,8,1], index: 2, kind: input, shape index: {}]   ;;  %s4661_s3 = inlined_call_operand.vmem [shape: f32[4,8,1], index: 3, kind: input, shape index: {}]   ;;  %s4662_s4 = inlined_call_operand.hbm [shape: f32[2,8,256], index: 4, kind: output, shape index: {}]  }
   0x1   :  { %11 = vsyncpa [#allocation5 + $0x1], 0  ;;  %s4039_s15 = smov 0   ;;  %s4041_s16 = smov 0  }
   0x2   :  { %s4043_s17 = smov 0   ;;  %s4045_s18 = smov 0  }
   0x3 LB: > { %s4060_s19 = sadd.s32 4294967295, %s3999_s18   ;;  %s3680_s20 = sadd.s32 4294967294, %s3999_s18   ;;  %s3999_s18 = sphi %s4045_s18, %s4676_s18   ;;  %s3995_s17 = sphi %s4043_s17, %s4675_s17   ;;  %s3991_s16 = sphi %s4041_s16, %s4674_s16   ;;  %s3987_s15 = sphi %s4039_s15, %s4673_s15  }
   0x4   : > { %s4064_s21 = sadd.s32 1, %s3999_s18   ;;  %s113_s22 = sadd.s32 1, %s3995_s17 }
   0x5   : > { %s110_s23 = ssub.s32 %s3999_s18, %s4064_s21  ;;  %p123_p0 = scmp.ne.s32.totalorder %s3995_s17, %s3991_s16 }
   0x6   : > { %p111_p1 = scmp.eq.s32.totalorder %s110_s23, 0  ;;  %p124_p2 = scmp.eq.s32.totalorder %s4060_s19, 1 }
   0x7   : > { %p129_p3 = scmp.ne.s32.totalorder %s3991_s16, %s3987_s15  ;;  %p130_p4 = scmp.eq.s32.totalorder %s3680_s20, 1 }
   0x8   : > { %s4075_s24 = scalar_select %p111_p1, %s3995_s17, %s113_s22  }
   0x9   : > { %p4077_p5 = por %p124_p2, %p123_p0  ;;  %p4081_p6 = por %p130_p4, %p129_p3 }
   0xa   : > { %p3683_p7 = scmp.ge.s32.totalorder %s3999_s18, 1  ;;  %p165_p8 = scmp.lt.s32.totalorder %s3999_s18, 3 }
   0xc   : > { %p166_p9 = pnand %p3683_p7, %p165_p8 }
   0xd   : > { %p191_p10 = scmp.lt.s32.totalorder (!%p166_p9), %s4060_s19, 1  ;;  %vm198_vm0 = vcmask (!%p166_p9), 523264   ;;  %v4001_v0 = vmov (!%p166_p9), 0.0   ;;  %s4002_s6 = smov (!%p166_p9), 32   ;;  %vm215_vm1 = vcmask (!%p166_p9), 1043712   ;;  %vm210_vm2 = vcmask (!%p166_p9), 261120  }
   0xe   : > { %169 = sbr.rel (%p166_p9) target bundleno = 2142 (0x85e), region = 36  ;;  %196 = vst [vmem:[#allocation2] sm:$0xff] (!%p166_p9), %v4001_v0  ;;  %197 = vst [vmem:[#allocation2 + $0x8] sm:$0xff] (!%p166_p9), %v4001_v0  ;;  %356 = vmatprep.mubr.f32.mxu0 (!%p166_p9), %v4001_v0  ;;  %1203 = vmatprep.mubr.f32.mxu1 (!%p166_p9), %v4001_v0  ;;  %vm218_vm3 = vcmask (!%p166_p9), 257024   ;;  %s4003_s7 = smov (!%p166_p9), 112   ;;  %v1074_v9 = vld [vmem:[%s4660_s2] sm:$0xff] (!%p166_p9)  ;;  %v220_v12 = vlaneseq (!%p166_p9) }
   0xf   : > { %200 = vst [vmem:[#allocation3] sm:$0xff] (!%p166_p9), %v4001_v0  ;;  %199 = vst.msk [vmem:[#allocation2 + $0x10] sm:$0xff] (!%p166_p9), %vm198_vm0, %v4001_v0  ;;  %s4004_s8 = smov (!%p166_p9), 113   ;;  %s4005_s9 = smov (!%p166_p9), 111   ;;  %v1082_v10 = vld [vmem:[%s4661_s3] sm:$0xff] (!%p166_p9)  ;;  %v4012_v11 = vmov (!%p166_p9), 0  }
  0x10   : > { %202 = vst.msk [vmem:[#allocation3 + $0x10] sm:$0xff] (!%p166_p9), %vm198_vm0, %v4001_v0  ;;  %s4006_s10 = smov (!%p166_p9), 97   ;;  %s4007_s11 = smov (!%p166_p9), 96   ;;  %3934 = vset.pattern.permute.xlu1 (!%p166_p9), %v4012_v11  ;;  %3935 = vset.pattern.permute.xlu0 (!%p166_p9), %v4012_v11  ;;  %v221_v14 = vand.u32 (!%p166_p9), 127, %v220_v12  ;;  %vm283_vm4 = vcmask (!%p166_p9), 916480   ;;  %v3687_v22 = vld [vmem:[%s4659_s1 + $0x8] sm:$0xff] (!%p166_p9) }
  0x11   : > { %s4008_s12 = smov (!%p166_p9), 95   ;;  %s4009_s13 = smov (!%p166_p9), 81   ;;  %vm288_vm5 = vcmask (!%p166_p9), 64512   ;;  %vm267_vm6 = vcmask (!%p166_p9), 924672   ;;  %v274_v33 = vld [vmem:[%s4659_s1] sm:$0xff] (!%p166_p9)  ;;  %vm447_vm9 = vcmask (!%p166_p9), 908288  }
  0x12   : > { %s4010_s14 = smov (!%p166_p9), 80   ;;  %s4011_s20 = smov (!%p166_p9), 79   ;;  %v222_v16 = vadd.s32 (!%p166_p9), 128, %v221_v14  ;;  %v227_v26 = vand.u32 (!%p166_p9), 15, %v221_v14  ;;  %vm538_vm12 = vcmask (!%p166_p9), 793600   ;;  %v3692_v42 = vld [vmem:[%s4659_s1 + $0x10] sm:$0xff] (!%p166_p9) }
  0x13   : > { %vm631_vm13 = vcmask (!%p166_p9), 785408   ;;  %v3696_v48 = vld [vmem:[%s4659_s1 + $0x18] sm:$0xff] (!%p166_p9)  ;;  %vm718_vm14 = vcmask (!%p166_p9), 777216   ;;  %v3700_v55 = vld [vmem:[%s4659_s1 + $0x20] sm:$0xff] (!%p166_p9)  ;;  %vm809_vm15 = vcmask (!%p166_p9), 662528   ;;  %v3702_v61 = vld [vmem:[%s4659_s1 + $0x28] sm:$0xff] (!%p166_p9) }
  0x14   : > { %v234_v19 = vand.u32 (!%p166_p9), 15, %v222_v16  ;;  %vm4149_vm8 = vcmp.ne.s32.totalorder (!%p166_p9), %v227_v26, 0  ;;  %vm4164_vm11 = vcmp.ne.s32.totalorder (!%p166_p9), %v227_v26, 15  ;;  %vm902_vm0 = vcmask (!%p166_p9), 654336   ;;  %v3712_v11 = vld [vmem:[%s4659_s1 + $0x40] sm:$0xff] (!%p166_p9)  ;;  %v3747_v26 = vld [vmem:[%s4661_s3 + $0x8] sm:$0xff] (!%p166_p9) }
  0x15   : > { %s192_s27 = scalar_select %p191_p10, %s4060_s19, 1  ;;  %v3800_v25 = vld [vmem:[%s4659_s1 + $0x108] sm:$0xff]  ;;  %v3806_v34 = vld [vmem:[%s4659_s1 + $0x118] sm:$0xff] }
  0x16   : > { %vm4140_vm7 = vcmp.ne.s32.totalorder %v234_v19, 0  ;;  %vm4159_vm10 = vcmp.ne.s32.totalorder %v234_v19, 15 }
  0x17   : > { %s3817_s28 = sshll.u32 %s192_s27, 3 }
  0x18   : > { %s195_s5 = scalar_lea.vmem %s4658_s0, %s3817_s28 }
  0x19   : > { %v203_v1 = vld [vmem:[%s195_s5] sm:$0xff] }
  0x1a   : > { %206 = vrot.lane.b32.xlu0 %v203_v1, %s4002_s6  ;;  %v205_v2 = vcombine.high %v203_v1, %v203_v1 }
  0x1e   : > { %208 = vrot.lane.b32.xlu0 %v205_v2, %s4002_s6 }
  0x8c   : > { %v207_v3 = vpop.permute.xlu0 %206 }
  0x8d   : > { %216 = vst.msk [vmem:[#allocation2] sm:$0xf] %vm215_vm1, %v207_v3  ;;  %vm989_vm1 = vcmask 646144  }
  0x90   : > { %v209_v4 = vpop.permute.xlu0 %208 }
  0x91   : > { %v211_v5 = vsel %vm210_vm2, %v207_v3, %v209_v4  ;;  %219 = vst.msk [vmem:[#allocation2 + $0x10] sm:$0xf] %vm218_vm3, %v209_v4  ;;  %v3706_v3 = vld [vmem:[%s4659_s1 + $0x30] sm:$0xff]  ;;  %vm1100_vm3 = vcmask 1047808  }
  0x92   : > { %217 = vst [vmem:[#allocation2 + $0x8] sm:$0xf] %v211_v5 }
  0x94   : > { %v251_v6 = vld [vmem:[#allocation2] sm:$0xff] }
  0x95   : > { %277 = vrot.lane.b32.xlu0 %v251_v6, %s4003_s7 }
  0x98   : > { %v253_v7 = vld [vmem:[#allocation2 + $0x10] sm:$0xff] }
  0x99   : > { %265 = vrot.lane.b32.xlu0 %v253_v7, %s4004_s8  ;;  %v252_v8 = vld [vmem:[#allocation2 + $0x8] sm:$0xff] }
  0x9a   : > { %279 = vrot.lane.b32.xlu1 %v252_v8, %s4003_s7 }
  0x9d   : > { %443 = vrot.lane.b32.xlu0 %v252_v8, %s4005_s9 }
  0x9e   : > { %281 = vrot.lane.b32.xlu1 %v253_v7, %s4003_s7 }
  0xa1   : > { %441 = vrot.lane.b32.xlu0 %v251_v6, %s4005_s9 }
  0xa2   : > { %263 = vrot.lane.b32.xlu1 %v252_v8, %s4004_s8 }
  0xa5   : > { %536 = vrot.lane.b32.xlu0 %v253_v7, %s4006_s10 }
  0xa6   : > { %261 = vrot.lane.b32.xlu1 %v251_v6, %s4004_s8 }
  0xa9   : > { %627 = vrot.lane.b32.xlu0 %v252_v8, %s4007_s11 }
  0xaa   : > { %445 = vrot.lane.b32.xlu1 %v253_v7, %s4005_s9 }
  0xad   : > { %625 = vrot.lane.b32.xlu0 %v251_v6, %s4007_s11 }
  0xae   : > { %534 = vrot.lane.b32.xlu1 %v252_v8, %s4006_s10 }
  0xb1   : > { %716 = vrot.lane.b32.xlu0 %v253_v7, %s4008_s12 }
  0xb2   : > { %532 = vrot.lane.b32.xlu1 %v251_v6, %s4006_s10 }
  0xb5   : > { %805 = vrot.lane.b32.xlu0 %v252_v8, %s4009_s13 }
  0xb6   : > { %629 = vrot.lane.b32.xlu1 %v253_v7, %s4007_s11 }
  0xb9   : > { %803 = vrot.lane.b32.xlu0 %v251_v6, %s4009_s13 }
  0xba   : > { %714 = vrot.lane.b32.xlu1 %v252_v8, %s4008_s12 }
  0xbd   : > { %900 = vrot.lane.b32.xlu0 %v253_v7, %s4010_s14 }
  0xbe   : > { %712 = vrot.lane.b32.xlu1 %v251_v6, %s4008_s12 }
  0xc1   : > { %985 = vrot.lane.b32.xlu0 %v252_v8, %s4011_s20 }
  0xc2   : > { %807 = vrot.lane.b32.xlu1 %v253_v7, %s4009_s13 }
  0xc5   : > { %983 = vrot.lane.b32.xlu0 %v251_v6, %s4011_s20 }
  0xc6   : > { %898 = vrot.lane.b32.xlu1 %v252_v8, %s4010_s14 }
  0xc9   : > { %1085 = vperm.xlu0 %3935, %v1082_v10  }
  0xca   : > { %896 = vrot.lane.b32.xlu1 %v251_v6, %s4010_s14 }
  0xce   : > { %987 = vrot.lane.b32.xlu1 %v253_v7, %s4011_s20 }
  0xd2   : > { %1077 = vperm.xlu1 %3934, %v1074_v9   ;;  %v3710_v9 = vld [vmem:[%s4659_s1 + $0x38] sm:$0xff] }
 0x107   : > { %v278_v13 = vpop.permute.xlu0 %277 }
 0x10b   : > { %v266_v15 = vpop.permute.xlu0 %265 }
 0x10c   : > { %v280_v17 = vpop.permute.xlu1 %279 }
 0x10d   : > { %v284_v23 = vsel %vm283_vm4, %v278_v13, %v280_v17 }
 0x10f   : > { %v444_v18 = vpop.permute.xlu0 %443 }
 0x110   : > { %v282_v20 = vpop.permute.xlu1 %281 }
 0x111   : > { %v285_v21 = vsel %vm283_vm4, %v280_v17, %v282_v20 }
 0x112   : > { %292 = vmatprep.subr.mxu0 %v285_v21 }
 0x113   : > { %293 = vmatpush1.msra.mxu0 %v284_v23  ;;  %v442_v24 = vpop.permute.xlu0 %441 }
 0x114   : > { %v264_v27 = vpop.permute.xlu1 %263  ;;  %3688 = vmatmul.mubr.msk.f32.vlgmr.msra.gmra.mrb[0].mxu0 %vm288_vm5, %v3687_v22  ;;  %v448_v38 = vsel %vm447_vm9, %v442_v24, %v444_v18 }
 0x115   : > { %v269_v28 = vsel %vm267_vm6, %v264_v27, %v266_v15  ;;  %430 = vmatprep.mubr.f32.mxu0 %v4001_v0 }
 0x116   : > { %3689 = vmatprep.subr.msk.mxu0 %vm4140_vm7, %v269_v28 }
 0x117   : > { %v537_v30 = vpop.permute.xlu0 %536 }
 0x118   : > { %v262_v31 = vpop.permute.xlu1 %261 }
 0x119   : > { %v268_v32 = vsel %vm267_vm6, %v262_v31, %v264_v27  ;;  %v3746_v27 = vld [vmem:[%s4660_s2 + $0x8] sm:$0xff] }
 0x11a   : > { %3690 = vmatpush1.msk.msra.mxu0 %vm4149_vm8, %v268_v32 }
 0x11b   : > { %v628_v39 = vpop.permute.xlu0 %627 }
 0x11c   : > { %v446_v35 = vpop.permute.xlu1 %445  ;;  %3691 = vmatmul.mubr.msk.f32.vlgmr.msra.gmra.mrb[0].mxu0 %vm288_vm5, %v274_v33  ;;  %v3717_v33 = vld [vmem:[%s4659_s1 + $0x50] sm:$0xff] }
 0x11d   : > { %v449_v37 = vsel %vm447_vm9, %v444_v18, %v446_v35  ;;  %523 = vmatprep.mubr.f32.mxu0 %v4001_v0 }
 0x11e   : > { %3693 = vmatprep.subr.msk.mxu0 %vm4159_vm10, %v449_v37 }
 0x11f   : > { %3694 = vmatpush1.msk.msra.mxu0 %vm4164_vm11, %v448_v38  ;;  %v626_v43 = vpop.permute.xlu0 %625 }
 0x120   : > { %v535_v40 = vpop.permute.xlu1 %534  ;;  %v632_v50 = vsel %vm631_vm13, %v626_v43, %v628_v39  ;;  %v3716_v43 = vld [vmem:[%s4659_s1 + $0x48] sm:$0xff] }
 0x121   : > { %v540_v41 = vsel %vm538_vm12, %v535_v40, %v537_v30 }
 0x122   : > { %3697 = vmatprep.subr.msk.mxu0 %vm4140_vm7, %v540_v41 }
 0x123   : > { %v717_v49 = vpop.permute.xlu0 %716 }
 0x124   : > { %v533_v44 = vpop.permute.xlu1 %532  ;;  %3695 = vmatmul.mubr.msk.f32.vlgmr.msra.gmra.mrb[0].mxu0 %vm288_vm5, %v3692_v42 }
 0x125   : > { %v539_v45 = vsel %vm538_vm12, %v533_v44, %v535_v40  ;;  %614 = vmatprep.mubr.f32.mxu0 %v4001_v0 }
 0x126   : > { %3698 = vmatpush1.msk.msra.mxu0 %vm4149_vm8, %v539_v45 }
 0x127   : > { %v806_v53 = vpop.permute.xlu0 %805 }
 0x128   : > { %v630_v46 = vpop.permute.xlu1 %629 }
 0x129   : > { %v633_v47 = vsel %vm631_vm13, %v628_v39, %v630_v46 }
 0x12a   : > { %639 = vmatprep.subr.mxu0 %v633_v47 }
 0x12b   : > { %v804_v59 = vpop.permute.xlu0 %803 }
 0x12c   : > { %v715_v51 = vpop.permute.xlu1 %714  ;;  %3699 = vmatmul.mubr.msk.f32.vlgmr.msra.gmra.mrb[0].mxu0 %vm288_vm5, %v3696_v48  ;;  %v810_v62 = vsel %vm809_vm15, %v804_v59, %v806_v53 }
 0x12d   : > { %640 = vmatpush1.msra.mxu0 %v632_v50  ;;  %v720_v52 = vsel %vm718_vm14, %v715_v51, %v717_v49  ;;  %703 = vmatprep.mubr.f32.mxu0 %v4001_v0 }
 0x12e   : > { %3703 = vmatprep.subr.msk.mxu0 %vm4159_vm10, %v720_v52 }
 0x12f   : > { %v901_v63 = vpop.permute.xlu0 %900 }
 0x130   : > { %v713_v54 = vpop.permute.xlu1 %712 }
 0x131   : > { %v719_v56 = vsel %vm718_vm14, %v713_v54, %v715_v51  ;;  %v3722_v51 = vld [vmem:[%s4659_s1 + $0x58] sm:$0xff] }
 0x133   : > { %v986_v5 = vpop.permute.xlu0 %985 }
 0x134   : > { %v808_v57 = vpop.permute.xlu1 %807  ;;  %3701 = vmatmul.mubr.msk.f32.vlgmr.msra.gmra.mrb[0].mxu0 %vm288_vm5, %v3700_v55 }
 0x135   : > { %v811_v58 = vsel %vm809_vm15, %v806_v53, %v808_v57  ;;  %3704 = vmatpush1.msk.msra.mxu0 %vm4164_vm11, %v719_v56  ;;  %794 = vmatprep.mubr.f32.mxu0 %v4001_v0 }
 0x136   : > { %3707 = vmatprep.subr.msk.mxu0 %vm4140_vm7, %v811_v58  ;;  %v3726_v58 = vld [vmem:[%s4659_s1 + $0x60] sm:$0xff] }
 0x137   : > { %v984_v8 = vpop.permute.xlu0 %983 }
 0x138   : > { %v899_v60 = vpop.permute.xlu1 %898  ;;  %v990_v10 = vsel %vm989_vm1, %v984_v8, %v986_v5  ;;  %v3732_v8 = vld [vmem:[%s4659_s1 + $0x70] sm:$0xff] }
 0x139   : > { %v904_v2 = vsel %vm902_vm0, %v899_v60, %v901_v63 }
 0x13c   : > { %v897_v1 = vpop.permute.xlu1 %896  ;;  %3705 = vmatmul.mubr.msk.f32.vlgmr.msra.gmra.mrb[0].mxu0 %vm288_vm5, %v3702_v61 }
 0x13d   : > { %3708 = vmatpush1.msk.msra.mxu0 %vm4149_vm8, %v810_v62  ;;  %885 = vmatprep.mubr.f32.mxu0 %v4001_v0  ;;  %v903_v6 = vsel %vm902_vm0, %v897_v1, %v899_v60 }
 0x13e   : > { %910 = vmatprep.subr.mxu0 %v904_v2  ;;  %v3730_v2 = vld [vmem:[%s4659_s1 + $0x68] sm:$0xff] }
 0x140   : > { %v988_v4 = vpop.permute.xlu1 %987 }
 0x141   : > { %v991_v7 = vsel %vm989_vm1, %v986_v5, %v988_v4 }
 0x144   : > { %3709 = vmatmul.mubr.msk.f32.vlgmr.msra.gmra.mrb[0].mxu0 %vm288_vm5, %v3706_v3 }
 0x145   : > { %911 = vmatpush1.msra.mxu0 %v903_v6  ;;  %974 = vmatprep.mubr.f32.mxu0 %v4001_v0 }
 0x146   : > { %3713 = vmatprep.subr.msk.mxu0 %vm4159_vm10, %v991_v7 }
 0x148   : > { %v1086_v14 = vpop.permute.xlu0 %1085 }
 0x14c   : > { %3711 = vmatmul.mubr.msk.f32.vlgmr.msra.gmra.mrb[0].mxu0 %vm288_vm5, %v3710_v9 }
 0x14d   : > { %3714 = vmatpush1.msk.msra.mxu0 %vm4164_vm11, %v990_v10  ;;  %1065 = vmatprep.mubr.f32.mxu0 %v4001_v0 }
 0x151   : > { %v1078_v12 = vpop.permute.xlu1 %1077 }
 0x154   : > { %3715 = vmatmul.mubr.msk.f32.vlgmr.msra.gmra.mrb[0].mxu0 %vm288_vm5, %v3712_v11 }
 0x155   : > { %2040 = vmatprep.mubr.f32.mxu0 %v4001_v0 }
 0x227   : > { %v1067_v13 = vpop.f32.mrb[0].mxu0 }
 0x228   : > { %v1080_v15 = vmul.f32 %v1078_v12, %v1067_v13  ;;  %v1069_v16 = vpop.f32.mrb[1].mxu0  ;;  %v3736_v13 = vld [vmem:[%s4659_s1 + $0x78] sm:$0xff] }
 0x229   : > { %v1081_v17 = vmul.f32 %v1078_v12, %v1069_v16 }
 0x22a   : > { %v1088_v18 = vadd.f32 %v1086_v14, %v1080_v15 }
 0x22b   : > { %v1089_v19 = vadd.f32 %v1086_v14, %v1081_v17 }
 0x22c   : > { %1092 = vrot.lane.b32.xlu1 %v1088_v18, %s4002_s6 }
 0x230   : > { %1094 = vrot.lane.b32.xlu1 %v1089_v19, %s4002_s6  ;;  %v3740_v19 = vld [vmem:[%s4659_s1 + $0x80] sm:$0xff] }
 0x29e   : > { %v1093_v20 = vpop.permute.xlu1 %1092 }
 0x29f   : > { %1101 = vst.msk [vmem:[#allocation3] sm:$0xff] %vm1100_vm3, %v1093_v20 }
 0x2a2   : > { %v1095_v21 = vpop.permute.xlu1 %1094 }
 0x2a3   : > { %v1096_v22 = vsel %vm210_vm2, %v1093_v20, %v1095_v21  ;;  %1103 = vst.msk [vmem:[#allocation3 + $0x10] sm:$0xff] %vm210_vm2, %v1095_v21  ;;  %v3742_v21 = vld [vmem:[%s4659_s1 + $0x88] sm:$0xff] }
 0x2a4   : > { %1128 = vrot.lane.b32.xlu0 %v1096_v22, %s4003_s7 }
 0x2a6   : > { %v1104_v23 = vld [vmem:[#allocation3] sm:$0xff] }
 0x2a8   : > { %1126 = vrot.lane.b32.xlu0 %v1104_v23, %s4003_s7 }
 0x2aa   : > { %v1106_v24 = vld [vmem:[#allocation3 + $0x10] sm:$0xff] }
 0x2ab   : > { %1130 = vrot.lane.b32.xlu1 %v1106_v24, %s4003_s7 }
 0x2ac   : > { %1114 = vrot.lane.b32.xlu0 %v1106_v24, %s4004_s8 }
 0x2af   : > { %1112 = vrot.lane.b32.xlu1 %v1096_v22, %s4004_s8 }
 0x2b0   : > { %1286 = vrot.lane.b32.xlu0 %v1096_v22, %s4005_s9 }
 0x2b3   : > { %1110 = vrot.lane.b32.xlu1 %v1104_v23, %s4004_s8 }
 0x2b4   : > { %1284 = vrot.lane.b32.xlu0 %v1104_v23, %s4005_s9 }
 0x2b7   : > { %1288 = vrot.lane.b32.xlu1 %v1106_v24, %s4005_s9 }
 0x2b8   : > { %1378 = vrot.lane.b32.xlu0 %v1106_v24, %s4006_s10 }
 0x2bb   : > { %1376 = vrot.lane.b32.xlu1 %v1096_v22, %s4006_s10 }
 0x2bc   : > { %1468 = vrot.lane.b32.xlu0 %v1096_v22, %s4007_s11 }
 0x2bf   : > { %1374 = vrot.lane.b32.xlu1 %v1104_v23, %s4006_s10 }
 0x2c0   : > { %1466 = vrot.lane.b32.xlu0 %v1104_v23, %s4007_s11 }
 0x2c3   : > { %1470 = vrot.lane.b32.xlu1 %v1106_v24, %s4007_s11 }
 0x2c4   : > { %1556 = vrot.lane.b32.xlu0 %v1106_v24, %s4008_s12 }
 0x2c7   : > { %1554 = vrot.lane.b32.xlu1 %v1096_v22, %s4008_s12 }
 0x2c8   : > { %1644 = vrot.lane.b32.xlu0 %v1096_v22, %s4009_s13 }
 0x2cb   : > { %1552 = vrot.lane.b32.xlu1 %v1104_v23, %s4008_s12 }
 0x2cc   : > { %1642 = vrot.lane.b32.xlu0 %v1104_v23, %s4009_s13 }
 0x2cf   : > { %1646 = vrot.lane.b32.xlu1 %v1106_v24, %s4009_s13 }
 0x2d0   : > { %1738 = vrot.lane.b32.xlu0 %v1106_v24, %s4010_s14 }
 0x2d3   : > { %1736 = vrot.lane.b32.xlu1 %v1096_v22, %s4010_s14 }
 0x2d4   : > { %1822 = vrot.lane.b32.xlu0 %v1096_v22, %s4011_s20 }
 0x2d7   : > { %1734 = vrot.lane.b32.xlu1 %v1104_v23, %s4010_s14 }
 0x2d8   : > { %1820 = vrot.lane.b32.xlu0 %v1104_v23, %s4011_s20 }
 0x2db   : > { %1824 = vrot.lane.b32.xlu1 %v1106_v24, %s4011_s20 }
 0x2dc   : > { %1923 = vperm.xlu0 %3935, %v3747_v26  }
 0x2df   : > { %1914 = vperm.xlu1 %3934, %v3746_v27  }
 0x316   : > { %v1129_v28 = vpop.permute.xlu0 %1128 }
 0x31a   : > { %v1127_v30 = vpop.permute.xlu0 %1126 }
 0x31b   : > { %v1132_v37 = vsel %vm283_vm4, %v1127_v30, %v1129_v28 }
 0x31d   : > { %v1131_v31 = vpop.permute.xlu1 %1130 }
 0x31e   : > { %v1133_v32 = vsel %vm283_vm4, %v1129_v28, %v1131_v31  ;;  %v1115_v35 = vpop.permute.xlu0 %1114 }
 0x31f   : > { %1139 = vmatprep.subr.mxu1 %v1133_v32 }
 0x320   : > { %1140 = vmatpush1.msra.mxu1 %v1132_v37 }
 0x321   : > { %v1113_v38 = vpop.permute.xlu1 %1112  ;;  %3718 = vmatmul.mubr.msk.f32.vlgmr.msra.gmra.mrb[0].mxu1 %vm288_vm5, %v3717_v33 }
 0x322   : > { %v1117_v39 = vsel %vm267_vm6, %v1113_v38, %v1115_v35  ;;  %v1287_v40 = vpop.permute.xlu0 %1286  ;;  %1277 = vmatprep.mubr.f32.mxu1 %v4001_v0 }
 0x323   : > { %3719 = vmatprep.subr.msk.mxu1 %vm4140_vm7, %v1117_v39  ;;  %v3779_v39 = vld [vmem:[%s4661_s3 + $0x10] sm:$0xff] }
 0x325   : > { %v1111_v41 = vpop.permute.xlu1 %1110 }
 0x326   : > { %v1116_v42 = vsel %vm267_vm6, %v1111_v41, %v1113_v38  ;;  %v1285_v44 = vpop.permute.xlu0 %1284 }
 0x327   : > { %3720 = vmatpush1.msk.msra.mxu1 %vm4149_vm8, %v1116_v42  ;;  %v1290_v48 = vsel %vm447_vm9, %v1285_v44, %v1287_v40 }
 0x329   : > { %v1289_v45 = vpop.permute.xlu1 %1288  ;;  %3721 = vmatmul.mubr.msk.f32.vlgmr.msra.gmra.mrb[0].mxu1 %vm288_vm5, %v3716_v43 }
 0x32a   : > { %v1291_v46 = vsel %vm447_vm9, %v1287_v40, %v1289_v45  ;;  %v1379_v47 = vpop.permute.xlu0 %1378  ;;  %1365 = vmatprep.mubr.f32.mxu1 %v4001_v0  ;;  %v3778_v40 = vld [vmem:[%s4660_s2 + $0x10] sm:$0xff]  ;;  %v3749_v45 = vld [vmem:[%s4659_s1 + $0x98] sm:$0xff] }
 0x32b   : > { %3723 = vmatprep.subr.msk.mxu1 %vm4159_vm10, %v1291_v46 }
 0x32c   : > { %3724 = vmatpush1.msk.msra.mxu1 %vm4164_vm11, %v1290_v48 }
 0x32d   : > { %v1377_v49 = vpop.permute.xlu1 %1376 }
 0x32e   : > { %v1381_v50 = vsel %vm538_vm12, %v1377_v49, %v1379_v47  ;;  %v1469_v52 = vpop.permute.xlu0 %1468 }
 0x32f   : > { %3727 = vmatprep.subr.msk.mxu1 %vm4140_vm7, %v1381_v50 }
 0x331   : > { %v1375_v53 = vpop.permute.xlu1 %1374  ;;  %3725 = vmatmul.mubr.msk.f32.vlgmr.msra.gmra.mrb[0].mxu1 %vm288_vm5, %v3722_v51 }
 0x332   : > { %v1380_v54 = vsel %vm538_vm12, %v1375_v53, %v1377_v49  ;;  %v1467_v55 = vpop.permute.xlu0 %1466  ;;  %1455 = vmatprep.mubr.f32.mxu1 %v4001_v0  ;;  %v3748_v53 = vld [vmem:[%s4659_s1 + $0x90] sm:$0xff] }
 0x333   : > { %3728 = vmatpush1.msk.msra.mxu1 %vm4149_vm8, %v1380_v54  ;;  %v1472_v61 = vsel %vm631_vm13, %v1467_v55, %v1469_v52 }
 0x335   : > { %v1471_v56 = vpop.permute.xlu1 %1470 }
 0x336   : > { %v1473_v57 = vsel %vm631_vm13, %v1469_v52, %v1471_v56  ;;  %v1557_v59 = vpop.permute.xlu0 %1556 }
 0x337   : > { %1479 = vmatprep.subr.mxu1 %v1473_v57 }
 0x339   : > { %v1555_v60 = vpop.permute.xlu1 %1554  ;;  %3729 = vmatmul.mubr.msk.f32.vlgmr.msra.gmra.mrb[0].mxu1 %vm288_vm5, %v3726_v58 }
 0x33a   : > { %1480 = vmatpush1.msra.mxu1 %v1472_v61  ;;  %v1559_v62 = vsel %vm718_vm14, %v1555_v60, %v1557_v59  ;;  %1543 = vmatprep.mubr.f32.mxu1 %v4001_v0  ;;  %v1645_v1 = vpop.permute.xlu0 %1644  ;;  %v3754_v61 = vld [vmem:[%s4659_s1 + $0xa0] sm:$0xff] }
 0x33b   : > { %3733 = vmatprep.subr.msk.mxu1 %vm4159_vm10, %v1559_v62 }
 0x33d   : > { %v1553_v63 = vpop.permute.xlu1 %1552 }
 0x33e   : > { %v1558_v3 = vsel %vm718_vm14, %v1553_v63, %v1555_v60  ;;  %v1643_v6 = vpop.permute.xlu0 %1642 }
 0x33f   : > { %v1648_v9 = vsel %vm809_vm15, %v1643_v6, %v1645_v1 }
 0x341   : > { %v1647_v4 = vpop.permute.xlu1 %1646  ;;  %3731 = vmatmul.mubr.msk.f32.vlgmr.msra.gmra.mrb[0].mxu1 %vm288_vm5, %v3730_v2 }
 0x342   : > { %v1649_v5 = vsel %vm809_vm15, %v1645_v1, %v1647_v4  ;;  %3734 = vmatpush1.msk.msra.mxu1 %vm4164_vm11, %v1558_v3  ;;  %1633 = vmatprep.mubr.f32.mxu1 %v4001_v0  ;;  %v1739_v11 = vpop.permute.xlu0 %1738 }
 0x343   : > { %3737 = vmatprep.subr.msk.mxu1 %vm4140_vm7, %v1649_v5  ;;  %v3758_v5 = vld [vmem:[%s4659_s1 + $0xa8] sm:$0xff] }
 0x345   : > { %v1737_v7 = vpop.permute.xlu1 %1736 }
 0x346   : > { %v1741_v12 = vsel %vm902_vm0, %v1737_v7, %v1739_v11  ;;  %v1823_v15 = vpop.permute.xlu0 %1822 }
 0x349   : > { %v1735_v10 = vpop.permute.xlu1 %1734  ;;  %3735 = vmatmul.mubr.msk.f32.vlgmr.msra.gmra.mrb[0].mxu1 %vm288_vm5, %v3732_v8 }
 0x34a   : > { %3738 = vmatpush1.msk.msra.mxu1 %vm4149_vm8, %v1648_v9  ;;  %1723 = vmatprep.mubr.f32.mxu1 %v4001_v0  ;;  %v1740_v16 = vsel %vm902_vm0, %v1735_v10, %v1737_v7  ;;  %v1821_v18 = vpop.permute.xlu0 %1820 }
 0x34b   : > { %1747 = vmatprep.subr.mxu1 %v1741_v12  ;;  %v1826_v20 = vsel %vm989_vm1, %v1821_v18, %v1823_v15  ;;  %v3762_v12 = vld [vmem:[%s4659_s1 + $0xb0] sm:$0xff]  ;;  %v3764_v18 = vld [vmem:[%s4659_s1 + $0xb8] sm:$0xff] }
 0x34d   : > { %v1825_v14 = vpop.permute.xlu1 %1824 }
 0x34e   : > { %v1827_v17 = vsel %vm989_vm1, %v1823_v15, %v1825_v14 }
 0x351   : > { %3739 = vmatmul.mubr.msk.f32.vlgmr.msra.gmra.mrb[0].mxu1 %vm288_vm5, %v3736_v13 }
 0x352   : > { %1748 = vmatpush1.msra.mxu1 %v1740_v16  ;;  %1811 = vmatprep.mubr.f32.mxu1 %v4001_v0 }
 0x353   : > { %3743 = vmatprep.subr.msk.mxu1 %vm4159_vm10, %v1827_v17 }
 0x359   : > { %3741 = vmatmul.mubr.msk.f32.vlgmr.msra.gmra.mrb[0].mxu1 %vm288_vm5, %v3740_v19 }
 0x35a   : > { %3744 = vmatpush1.msk.msra.mxu1 %vm4164_vm11, %v1826_v20  ;;  %1901 = vmatprep.mubr.f32.mxu1 %v4001_v0 }
 0x35b   : > { %v1924_v27 = vpop.permute.xlu0 %1923 }
 0x35e   : > { %v1915_v22 = vpop.permute.xlu1 %1914 }
 0x361   : > { %3745 = vmatmul.mubr.msk.f32.vlgmr.msra.gmra.mrb[0].mxu1 %vm288_vm5, %v3742_v21 }
 0x362   : > { %2877 = vmatprep.mubr.f32.mxu1 %v4001_v0 }
 0x434   : > { %v1903_v23 = vpop.f32.mrb[0].mxu1 }
 0x435   : > { %v1917_v24 = vmul.f32 %v1915_v22, %v1903_v23  ;;  %v1905_v26 = vpop.f32.mrb[1].mxu1  ;;  %v3768_v23 = vld [vmem:[%s4659_s1 + $0xc0] sm:$0xff] }
 0x436   : > { %v1918_v28 = vmul.f32 %v1915_v22, %v1905_v26 }
 0x437   : > { %v1926_v30 = vadd.f32 %v1924_v27, %v1917_v24 }
 0x438   : > { %v1927_v31 = vadd.f32 %v1924_v27, %v1918_v28 }
 0x439   : > { %1930 = vrot.lane.b32.xlu1 %v1926_v30, %s4002_s6 }
 0x43a   : > { %1932 = vrot.lane.b32.xlu0 %v1927_v31, %s4002_s6  ;;  %v3772_v31 = vld [vmem:[%s4659_s1 + $0xc8] sm:$0xff] }
 0x4ab   : > { %v1931_v32 = vpop.permute.xlu1 %1930 }
 0x4ac   : > { %1938 = vst.msk [vmem:[#allocation2] sm:$0xff] %vm1100_vm3, %v1931_v32  ;;  %v1933_v33 = vpop.permute.xlu0 %1932 }
 0x4ad   : > { %v1934_v35 = vsel %vm210_vm2, %v1931_v32, %v1933_v33  ;;  %1940 = vst.msk [vmem:[#allocation2 + $0x10] sm:$0xff] %vm210_vm2, %v1933_v33  ;;  %v3774_v33 = vld [vmem:[%s4659_s1 + $0xd0] sm:$0xff] }
 0x4ae   : > { %1939 = vst [vmem:[#allocation2 + $0x8] sm:$0xff] %v1934_v35  ;;  %1965 = vrot.lane.b32.xlu1 %v1934_v35, %s4003_s7 }
 0x4b3   : > { %v1941_v37 = vld [vmem:[#allocation2] sm:$0xff] }
 0x4b4   : > { %v1943_v38 = vld [vmem:[#allocation2 + $0x10] sm:$0xff]  ;;  %1963 = vrot.lane.b32.xlu1 %v1941_v37, %s4003_s7 }
 0x4b5   : > { %1967 = vrot.lane.b32.xlu0 %v1943_v38, %s4003_s7 }
 0x4b8   : > { %1951 = vrot.lane.b32.xlu1 %v1943_v38, %s4004_s8 }
 0x4b9   : > { %1949 = vrot.lane.b32.xlu0 %v1934_v35, %s4004_s8 }
 0x4bc   : > { %2123 = vrot.lane.b32.xlu1 %v1934_v35, %s4005_s9 }
 0x4bd   : > { %1947 = vrot.lane.b32.xlu0 %v1941_v37, %s4004_s8 }
 0x4c0   : > { %2121 = vrot.lane.b32.xlu1 %v1941_v37, %s4005_s9 }
 0x4c1   : > { %2125 = vrot.lane.b32.xlu0 %v1943_v38, %s4005_s9 }
 0x4c4   : > { %2215 = vrot.lane.b32.xlu1 %v1943_v38, %s4006_s10 }
 0x4c5   : > { %2213 = vrot.lane.b32.xlu0 %v1934_v35, %s4006_s10 }
 0x4c8   : > { %2305 = vrot.lane.b32.xlu1 %v1934_v35, %s4007_s11 }
 0x4c9   : > { %2211 = vrot.lane.b32.xlu0 %v1941_v37, %s4006_s10 }
 0x4cc   : > { %2303 = vrot.lane.b32.xlu1 %v1941_v37, %s4007_s11 }
 0x4cd   : > { %2307 = vrot.lane.b32.xlu0 %v1943_v38, %s4007_s11 }
 0x4d0   : > { %2393 = vrot.lane.b32.xlu1 %v1943_v38, %s4008_s12 }
 0x4d1   : > { %2391 = vrot.lane.b32.xlu0 %v1934_v35, %s4008_s12 }
 0x4d4   : > { %2481 = vrot.lane.b32.xlu1 %v1934_v35, %s4009_s13 }
 0x4d5   : > { %2389 = vrot.lane.b32.xlu0 %v1941_v37, %s4008_s12 }
 0x4d8   : > { %2479 = vrot.lane.b32.xlu1 %v1941_v37, %s4009_s13 }
 0x4d9   : > { %2483 = vrot.lane.b32.xlu0 %v1943_v38, %s4009_s13 }
 0x4dc   : > { %2575 = vrot.lane.b32.xlu1 %v1943_v38, %s4010_s14 }
 0x4dd   : > { %2573 = vrot.lane.b32.xlu0 %v1934_v35, %s4010_s14 }
 0x4e0   : > { %2659 = vrot.lane.b32.xlu1 %v1934_v35, %s4011_s20 }
 0x4e1   : > { %2571 = vrot.lane.b32.xlu0 %v1941_v37, %s4010_s14 }
 0x4e4   : > { %2657 = vrot.lane.b32.xlu1 %v1941_v37, %s4011_s20 }
 0x4e5   : > { %2661 = vrot.lane.b32.xlu0 %v1943_v38, %s4011_s20 }
 0x4e8   : > { %2760 = vperm.xlu1 %3934, %v3779_v39  }
 0x4e9   : > { %2751 = vperm.xlu0 %3935, %v3778_v40  }
 0x520   : > { %v1966_v41 = vpop.permute.xlu1 %1965 }
 0x526   : > { %v1964_v42 = vpop.permute.xlu1 %1963 }
 0x527   : > { %v1968_v43 = vpop.permute.xlu0 %1967  ;;  %v1969_v46 = vsel %vm283_vm4, %v1964_v42, %v1966_v41 }
 0x528   : > { %v1970_v44 = vsel %vm283_vm4, %v1966_v41, %v1968_v43 }
 0x529   : > { %1976 = vmatprep.subr.mxu0 %v1970_v44 }
 0x52a   : > { %1977 = vmatpush1.msra.mxu0 %v1969_v46  ;;  %v1952_v47 = vpop.permute.xlu1 %1951 }
 0x52b   : > { %v1950_v48 = vpop.permute.xlu0 %1949  ;;  %3750 = vmatmul.mubr.msk.f32.vlgmr.msra.gmra.mrb[2].mxu0 %vm288_vm5, %v3749_v45 }
 0x52c   : > { %v1954_v49 = vsel %vm267_vm6, %v1950_v48, %v1952_v47  ;;  %2114 = vmatprep.mubr.f32.mxu0 %v4001_v0 }
 0x52d   : > { %3751 = vmatprep.subr.msk.mxu0 %vm4140_vm7, %v1954_v49  ;;  %v3811_v49 = vld [vmem:[%s4661_s3 + $0x18] sm:$0xff] }
 0x52e   : > { %v2124_v50 = vpop.permute.xlu1 %2123 }
 0x52f   : > { %v1948_v51 = vpop.permute.xlu0 %1947 }
 0x530   : > { %v1953_v52 = vsel %vm267_vm6, %v1948_v51, %v1950_v48 }
 0x531   : > { %3752 = vmatpush1.msk.msra.mxu0 %vm4149_vm8, %v1953_v52 }
 0x532   : > { %v2122_v54 = vpop.permute.xlu1 %2121 }
 0x533   : > { %v2126_v55 = vpop.permute.xlu0 %2125  ;;  %3753 = vmatmul.mubr.msk.f32.vlgmr.msra.gmra.mrb[2].mxu0 %vm288_vm5, %v3748_v53  ;;  %v2127_v57 = vsel %vm447_vm9, %v2122_v54, %v2124_v50 }
 0x534   : > { %v2128_v56 = vsel %vm447_vm9, %v2124_v50, %v2126_v55  ;;  %2202 = vmatprep.mubr.f32.mxu0 %v4001_v0  ;;  %v3810_v50 = vld [vmem:[%s4660_s2 + $0x18] sm:$0xff]  ;;  %v3781_v55 = vld [vmem:[%s4659_s1 + $0xe0] sm:$0xff] }
 0x535   : > { %3755 = vmatprep.subr.msk.mxu0 %vm4159_vm10, %v2128_v56 }
 0x536   : > { %3756 = vmatpush1.msk.msra.mxu0 %vm4164_vm11, %v2127_v57  ;;  %v2216_v58 = vpop.permute.xlu1 %2215 }
 0x537   : > { %v2214_v59 = vpop.permute.xlu0 %2213 }
 0x538   : > { %v2218_v60 = vsel %vm538_vm12, %v2214_v59, %v2216_v58 }
 0x539   : > { %3759 = vmatprep.subr.msk.mxu0 %vm4140_vm7, %v2218_v60 }
 0x53a   : > { %v2306_v62 = vpop.permute.xlu1 %2305 }
 0x53b   : > { %v2212_v63 = vpop.permute.xlu0 %2211  ;;  %3757 = vmatmul.mubr.msk.f32.vlgmr.msra.gmra.mrb[2].mxu0 %vm288_vm5, %v3754_v61 }
 0x53c   : > { %v2217_v1 = vsel %vm538_vm12, %v2212_v63, %v2214_v59  ;;  %2292 = vmatprep.mubr.f32.mxu0 %v4001_v0  ;;  %v3780_v63 = vld [vmem:[%s4659_s1 + $0xd8] sm:$0xff] }
 0x53d   : > { %3760 = vmatpush1.msk.msra.mxu0 %vm4149_vm8, %v2217_v1 }
 0x53e   : > { %v2304_v2 = vpop.permute.xlu1 %2303 }
 0x53f   : > { %v2308_v3 = vpop.permute.xlu0 %2307  ;;  %v2309_v8 = vsel %vm631_vm13, %v2304_v2, %v2306_v62 }
 0x540   : > { %v2310_v4 = vsel %vm631_vm13, %v2306_v62, %v2308_v3 }
 0x541   : > { %2316 = vmatprep.subr.mxu0 %v2310_v4 }
 0x542   : > { %v2394_v6 = vpop.permute.xlu1 %2393 }
 0x543   : > { %v2392_v7 = vpop.permute.xlu0 %2391  ;;  %3761 = vmatmul.mubr.msk.f32.vlgmr.msra.gmra.mrb[2].mxu0 %vm288_vm5, %v3758_v5 }
 0x544   : > { %2317 = vmatpush1.msra.mxu0 %v2309_v8  ;;  %v2396_v9 = vsel %vm718_vm14, %v2392_v7, %v2394_v6  ;;  %2380 = vmatprep.mubr.f32.mxu0 %v4001_v0  ;;  %v3786_v8 = vld [vmem:[%s4659_s1 + $0xe8] sm:$0xff] }
 0x545   : > { %3765 = vmatprep.subr.msk.mxu0 %vm4159_vm10, %v2396_v9 }
 0x546   : > { %v2482_v10 = vpop.permute.xlu1 %2481 }
 0x547   : > { %v2390_v11 = vpop.permute.xlu0 %2389 }
 0x548   : > { %v2395_v13 = vsel %vm718_vm14, %v2390_v11, %v2392_v7 }
 0x54a   : > { %v2480_v15 = vpop.permute.xlu1 %2479 }
 0x54b   : > { %v2484_v14 = vpop.permute.xlu0 %2483  ;;  %3763 = vmatmul.mubr.msk.f32.vlgmr.msra.gmra.mrb[2].mxu0 %vm288_vm5, %v3762_v12  ;;  %v2485_v20 = vsel %vm809_vm15, %v2480_v15, %v2482_v10  ;;  %v3790_v15 = vld [vmem:[%s4659_s1 + $0xf0] sm:$0xff] }
 0x54c   : > { %v2486_v16 = vsel %vm809_vm15, %v2482_v10, %v2484_v14  ;;  %3766 = vmatpush1.msk.msra.mxu0 %vm4164_vm11, %v2395_v13  ;;  %2470 = vmatprep.mubr.f32.mxu0 %v4001_v0 }
 0x54d   : > { %3769 = vmatprep.subr.msk.mxu0 %vm4140_vm7, %v2486_v16 }
 0x54e   : > { %v2576_v19 = vpop.permute.xlu1 %2575 }
 0x54f   : > { %v2574_v17 = vpop.permute.xlu0 %2573 }
 0x550   : > { %v2578_v22 = vsel %vm902_vm0, %v2574_v17, %v2576_v19 }
 0x552   : > { %v2660_v26 = vpop.permute.xlu1 %2659 }
 0x553   : > { %v2572_v21 = vpop.permute.xlu0 %2571  ;;  %3767 = vmatmul.mubr.msk.f32.vlgmr.msra.gmra.mrb[2].mxu0 %vm288_vm5, %v3764_v18 }
 0x554   : > { %3770 = vmatpush1.msk.msra.mxu0 %vm4149_vm8, %v2485_v20  ;;  %2560 = vmatprep.mubr.f32.mxu0 %v4001_v0  ;;  %v2577_v27 = vsel %vm902_vm0, %v2572_v21, %v2574_v17 }
 0x555   : > { %2584 = vmatprep.subr.mxu0 %v2578_v22  ;;  %v3794_v22 = vld [vmem:[%s4659_s1 + $0xf8] sm:$0xff] }
 0x556   : > { %v2658_v30 = vpop.permute.xlu1 %2657 }
 0x557   : > { %v2662_v24 = vpop.permute.xlu0 %2661  ;;  %v2663_v32 = vsel %vm989_vm1, %v2658_v30, %v2660_v26  ;;  %v3796_v30 = vld [vmem:[%s4659_s1 + $0x100] sm:$0xff] }
 0x558   : > { %v2664_v28 = vsel %vm989_vm1, %v2660_v26, %v2662_v24 }
 0x55b   : > { %3771 = vmatmul.mubr.msk.f32.vlgmr.msra.gmra.mrb[2].mxu0 %vm288_vm5, %v3768_v23 }
 0x55c   : > { %2585 = vmatpush1.msra.mxu0 %v2577_v27  ;;  %2648 = vmatprep.mubr.f32.mxu0 %v4001_v0 }
 0x55d   : > { %3775 = vmatprep.subr.msk.mxu0 %vm4159_vm10, %v2664_v28 }
 0x563   : > { %3773 = vmatmul.mubr.msk.f32.vlgmr.msra.gmra.mrb[2].mxu0 %vm288_vm5, %v3772_v31 }
 0x564   : > { %3776 = vmatpush1.msk.msra.mxu0 %vm4164_vm11, %v2663_v32  ;;  %2738 = vmatprep.mubr.f32.mxu0 %v4001_v0 }
 0x567   : > { %v2761_v40 = vpop.permute.xlu1 %2760 }
 0x568   : > { %v2752_v35 = vpop.permute.xlu0 %2751 }
 0x56b   : > { %3777 = vmatmul.mubr.msk.f32.vlgmr.msra.gmra.mrb[2].mxu0 %vm288_vm5, %v3774_v33 }
 0x63e   : > { %v2740_v37 = vpop.f32.mrb[2].mxu0 }
 0x63f   : > { %v2754_v38 = vmul.f32 %v2752_v35, %v2740_v37  ;;  %v2742_v39 = vpop.f32.mrb[3].mxu0 }
 0x640   : > { %v2755_v41 = vmul.f32 %v2752_v35, %v2742_v39 }
 0x641   : > { %v2763_v42 = vadd.f32 %v2761_v40, %v2754_v38 }
 0x642   : > { %v2764_v43 = vadd.f32 %v2761_v40, %v2755_v41  ;;  %v3804_v41 = vld [vmem:[%s4659_s1 + $0x110] sm:$0xff] }
 0x643   : > { %2767 = vrot.lane.b32.xlu0 %v2763_v42, %s4002_s6 }
 0x644   : > { %2769 = vrot.lane.b32.xlu1 %v2764_v43, %s4002_s6 }
 0x6b5   : > { %v2768_v44 = vpop.permute.xlu0 %2767 }
 0x6b6   : > { %2775 = vst.msk [vmem:[#allocation3] sm:$0xff] %vm1100_vm3, %v2768_v44  ;;  %v2770_v45 = vpop.permute.xlu1 %2769 }
 0x6b7   : > { %v2771_v46 = vsel %vm210_vm2, %v2768_v44, %v2770_v45  ;;  %2777 = vst.msk [vmem:[#allocation3 + $0x10] sm:$0xff] %vm210_vm2, %v2770_v45 }
 0x6b8   : > { %2802 = vrot.lane.b32.xlu0 %v2771_v46, %s4003_s7 }
 0x6bd   : > { %v2778_v47 = vld [vmem:[#allocation3] sm:$0xff] }
 0x6be   : > { %v2780_v48 = vld [vmem:[#allocation3 + $0x10] sm:$0xff]  ;;  %2800 = vrot.lane.b32.xlu0 %v2778_v47, %s4003_s7 }
 0x6bf   : > { %2804 = vrot.lane.b32.xlu1 %v2780_v48, %s4003_s7 }
 0x6c2   : > { %2788 = vrot.lane.b32.xlu0 %v2780_v48, %s4004_s8 }
 0x6c3   : > { %2786 = vrot.lane.b32.xlu1 %v2771_v46, %s4004_s8 }
 0x6c6   : > { %2960 = vrot.lane.b32.xlu0 %v2771_v46, %s4005_s9 }
 0x6c7   : > { %2784 = vrot.lane.b32.xlu1 %v2778_v47, %s4004_s8 }
 0x6ca   : > { %2958 = vrot.lane.b32.xlu0 %v2778_v47, %s4005_s9 }
 0x6cb   : > { %2962 = vrot.lane.b32.xlu1 %v2780_v48, %s4005_s9 }
 0x6ce   : > { %3052 = vrot.lane.b32.xlu0 %v2780_v48, %s4006_s10 }
 0x6cf   : > { %3050 = vrot.lane.b32.xlu1 %v2771_v46, %s4006_s10 }
 0x6d2   : > { %3142 = vrot.lane.b32.xlu0 %v2771_v46, %s4007_s11 }
 0x6d3   : > { %3048 = vrot.lane.b32.xlu1 %v2778_v47, %s4006_s10 }
 0x6d6   : > { %3140 = vrot.lane.b32.xlu0 %v2778_v47, %s4007_s11 }
 0x6d7   : > { %3144 = vrot.lane.b32.xlu1 %v2780_v48, %s4007_s11  ;;  %s188_s11 = sand.u32 1, %s3991_s16  }
 0x6d8   : > { %s3607_s5 = scalar_lea.sflag [#allocation5], %s188_s11 }
 0x6da   : > { %3230 = vrot.lane.b32.xlu0 %v2780_v48, %s4008_s12 }
 0x6db   : > { %3228 = vrot.lane.b32.xlu1 %v2771_v46, %s4008_s12 }
 0x6de   : > { %3318 = vrot.lane.b32.xlu0 %v2771_v46, %s4009_s13 }
 0x6df   : > { %3226 = vrot.lane.b32.xlu1 %v2778_v47, %s4008_s12  ;;  %s3684_s12 = sshll.u32 %s188_s11, 4 }
 0x6e2   : > { %3316 = vrot.lane.b32.xlu0 %v2778_v47, %s4009_s13 }
 0x6e3   : > { %3320 = vrot.lane.b32.xlu1 %v2780_v48, %s4009_s13  ;;  %s3818_s13 = sshll.u32 %s4060_s19, 8  ;;  %s4013_s19 = smov [#allocation4]  }
 0x6e4   : > { %s4616_s30 = scalar_lea.hbm %s4662_s4, %s3818_s13  ;;  %s3941_s23 = sshll.u32 %s4013_s19, 4  ;;  %s3942_s23 = int_to_ptr.vmem [resolvable:$false] %s3941_s23 }
 0x6e5   : > { %s3943_s27 = scalar_lea.vmem %s3942_s23, 512 }
 0x6e6   : > { %3412 = vrot.lane.b32.xlu0 %v2780_v48, %s4010_s14 }
 0x6e7   : > { %3410 = vrot.lane.b32.xlu1 %v2771_v46, %s4010_s14 }
 0x6ea   : > { %3496 = vrot.lane.b32.xlu0 %v2771_v46, %s4011_s20 }
 0x6eb   : > { %3408 = vrot.lane.b32.xlu1 %v2778_v47, %s4010_s14  ;;  %s190_s14 = scalar_lea.vmem [#allocation4], %s3684_s12 }
 0x6ee   : > { %3494 = vrot.lane.b32.xlu0 %v2778_v47, %s4011_s20 }
 0x6ef   : > { %3498 = vrot.lane.b32.xlu1 %v2780_v48, %s4011_s20  ;;  %s3621_s20 = sshll.u32 %s190_s14, 4  ;;  %s4618_s20 = int_to_ptr.vmem [resolvable:$true] %s3621_s20 }
 0x6f0   : > { %s3937_s22 = scalar_lea.vmem %s4618_s20, 256  ;;  %p3944_p0 = scmp.lt.s32.totalorder %s4618_s20, %s3942_s23 }
 0x6f1   : > { %p3938_p11 = scmp.ne.s32.totalorder %s4618_s20, %s3937_s22  ;;  %p3945_p1 = scmp.lt.s32.totalorder %s3943_s27, %s3937_s22 }
 0x6f2   : > { %3597 = vperm.xlu0 %3935, %v3811_v49  }
 0x6f3   : > { %3588 = vperm.xlu1 %3934, %v3810_v50   ;;  %p3939_p12 = pnand %p3938_p11, %p4077_p5  ;;  %p3946_p2 = por %p3945_p1, %p3944_p0 }
 0x6f5   : > { %p3940_p13 = pneg %p3939_p12 }
 0x6f7   : > { %p3947_p3 = pnand %p3946_p2, %p3940_p13 }
 0x72a   : > { %v2803_v51 = vpop.permute.xlu0 %2802 }
 0x730   : > { %v2801_v52 = vpop.permute.xlu0 %2800 }
 0x731   : > { %v2805_v53 = vpop.permute.xlu1 %2804  ;;  %v2806_v56 = vsel %vm283_vm4, %v2801_v52, %v2803_v51 }
 0x732   : > { %v2807_v54 = vsel %vm283_vm4, %v2803_v51, %v2805_v53 }
 0x733   : > { %2813 = vmatprep.subr.mxu1 %v2807_v54 }
 0x734   : > { %2814 = vmatpush1.msra.mxu1 %v2806_v56  ;;  %v2789_v57 = vpop.permute.xlu0 %2788 }
 0x735   : > { %v2787_v58 = vpop.permute.xlu1 %2786  ;;  %3782 = vmatmul.mubr.msk.f32.vlgmr.msra.gmra.mrb[2].mxu1 %vm288_vm5, %v3781_v55 }
 0x736   : > { %v2791_v59 = vsel %vm267_vm6, %v2787_v58, %v2789_v57  ;;  %2951 = vmatprep.mubr.f32.mxu1 %v4001_v0 }
 0x737   : > { %3783 = vmatprep.subr.msk.mxu1 %vm4140_vm7, %v2791_v59 }
 0x738   : > { %v2961_v60 = vpop.permute.xlu0 %2960 }
 0x739   : > { %v2785_v61 = vpop.permute.xlu1 %2784 }
 0x73a   : > { %v2790_v62 = vsel %vm267_vm6, %v2785_v61, %v2787_v58 }
 0x73b   : > { %3784 = vmatpush1.msk.msra.mxu1 %vm4149_vm8, %v2790_v62 }
 0x73c   : > { %v2959_v1 = vpop.permute.xlu0 %2958 }
 0x73d   : > { %v2963_v2 = vpop.permute.xlu1 %2962  ;;  %3785 = vmatmul.mubr.msk.f32.vlgmr.msra.gmra.mrb[2].mxu1 %vm288_vm5, %v3780_v63  ;;  %v2964_v4 = vsel %vm447_vm9, %v2959_v1, %v2961_v60 }
 0x73e   : > { %v2965_v3 = vsel %vm447_vm9, %v2961_v60, %v2963_v2  ;;  %3039 = vmatprep.mubr.f32.mxu1 %v4001_v0 }
 0x73f   : > { %3787 = vmatprep.subr.msk.mxu1 %vm4159_vm10, %v2965_v3 }
 0x740   : > { %3788 = vmatpush1.msk.msra.mxu1 %vm4164_vm11, %v2964_v4  ;;  %v3053_v5 = vpop.permute.xlu0 %3052 }
 0x741   : > { %v3051_v6 = vpop.permute.xlu1 %3050 }
 0x742   : > { %v3055_v7 = vsel %vm538_vm12, %v3051_v6, %v3053_v5 }
 0x743   : > { %3791 = vmatprep.subr.msk.mxu1 %vm4140_vm7, %v3055_v7 }
 0x744   : > { %v3143_v9 = vpop.permute.xlu0 %3142 }
 0x745   : > { %v3049_v10 = vpop.permute.xlu1 %3048  ;;  %3789 = vmatmul.mubr.msk.f32.vlgmr.msra.gmra.mrb[2].mxu1 %vm288_vm5, %v3786_v8 }
 0x746   : > { %v3054_v11 = vsel %vm538_vm12, %v3049_v10, %v3051_v6  ;;  %3129 = vmatprep.mubr.f32.mxu1 %v4001_v0 }
 0x747   : > { %3792 = vmatpush1.msk.msra.mxu1 %vm4149_vm8, %v3054_v11 }
 0x748   : > { %v3141_v12 = vpop.permute.xlu0 %3140 }
 0x749   : > { %v3145_v13 = vpop.permute.xlu1 %3144  ;;  %v3146_v18 = vsel %vm631_vm13, %v3141_v12, %v3143_v9 }
 0x74a   : > { %v3147_v14 = vsel %vm631_vm13, %v3143_v9, %v3145_v13 }
 0x74b   : > { %3153 = vmatprep.subr.mxu1 %v3147_v14 }
 0x74c   : > { %v3231_v16 = vpop.permute.xlu0 %3230 }
 0x74d   : > { %v3229_v17 = vpop.permute.xlu1 %3228  ;;  %3793 = vmatmul.mubr.msk.f32.vlgmr.msra.gmra.mrb[2].mxu1 %vm288_vm5, %v3790_v15 }
 0x74e   : > { %3154 = vmatpush1.msra.mxu1 %v3146_v18  ;;  %v3233_v19 = vsel %vm718_vm14, %v3229_v17, %v3231_v16  ;;  %3217 = vmatprep.mubr.f32.mxu1 %v4001_v0 }
 0x74f   : > { %3797 = vmatprep.subr.msk.mxu1 %vm4159_vm10, %v3233_v19 }
 0x750   : > { %v3319_v20 = vpop.permute.xlu0 %3318 }
 0x751   : > { %v3227_v21 = vpop.permute.xlu1 %3226 }
 0x752   : > { %v3232_v23 = vsel %vm718_vm14, %v3227_v21, %v3229_v17 }
 0x754   : > { %v3317_v26 = vpop.permute.xlu0 %3316 }
 0x755   : > { %v3321_v24 = vpop.permute.xlu1 %3320  ;;  %3795 = vmatmul.mubr.msk.f32.vlgmr.msra.gmra.mrb[2].mxu1 %vm288_vm5, %v3794_v22  ;;  %v3322_v32 = vsel %vm809_vm15, %v3317_v26, %v3319_v20 }
 0x756   : > { %v3323_v27 = vsel %vm809_vm15, %v3319_v20, %v3321_v24  ;;  %3798 = vmatpush1.msk.msra.mxu1 %vm4164_vm11, %v3232_v23  ;;  %3307 = vmatprep.mubr.f32.mxu1 %v4001_v0 }
 0x757   : > { %3801 = vmatprep.subr.msk.mxu1 %vm4140_vm7, %v3323_v27 }
 0x758   : > { %v3413_v31 = vpop.permute.xlu0 %3412 }
 0x759   : > { %v3411_v28 = vpop.permute.xlu1 %3410 }
 0x75a   : > { %v3415_v35 = vsel %vm902_vm0, %v3411_v28, %v3413_v31 }
 0x75c   : > { %v3497_v38 = vpop.permute.xlu0 %3496 }
 0x75d   : > { %v3409_v33 = vpop.permute.xlu1 %3408  ;;  %3799 = vmatmul.mubr.msk.f32.vlgmr.msra.gmra.mrb[2].mxu1 %vm288_vm5, %v3796_v30 }
 0x75e   : > { %3802 = vmatpush1.msk.msra.mxu1 %vm4149_vm8, %v3322_v32  ;;  %3397 = vmatprep.mubr.f32.mxu1 %v4001_v0  ;;  %v3414_v39 = vsel %vm902_vm0, %v3409_v33, %v3411_v28 }
 0x75f   : > { %3421 = vmatprep.subr.mxu1 %v3415_v35 }
 0x760   : > { %v3495_v29 = vpop.permute.xlu0 %3494 }
 0x761   : > { %v3499_v37 = vpop.permute.xlu1 %3498  ;;  %v3500_v42 = vsel %vm989_vm1, %v3495_v29, %v3497_v38 }
 0x762   : > { %v3501_v40 = vsel %vm989_vm1, %v3497_v38, %v3499_v37 }
 0x765   : > { %3803 = vmatmul.mubr.msk.f32.vlgmr.msra.gmra.mrb[2].mxu1 %vm288_vm5, %v3800_v25 }
 0x766   : > { %3422 = vmatpush1.msra.mxu1 %v3414_v39  ;;  %3485 = vmatprep.mubr.f32.mxu1 %v4001_v0 }
 0x767   : > { %3807 = vmatprep.subr.msk.mxu1 %vm4159_vm10, %v3501_v40 }
 0x76d   : > { %3805 = vmatmul.mubr.msk.f32.vlgmr.msra.gmra.mrb[2].mxu1 %vm288_vm5, %v3804_v41 }
 0x76e   : > { %3808 = vmatpush1.msk.msra.mxu1 %vm4164_vm11, %v3500_v42  ;;  %3575 = vmatprep.mubr.f32.mxu1 %v4001_v0 }
 0x771   : > { %v3598_v47 = vpop.permute.xlu0 %3597 }
 0x772   : > { %v3589_v43 = vpop.permute.xlu1 %3588 }
 0x775   : > { %3809 = vmatmul.mubr.msk.f32.vlgmr.msra.gmra.mrb[2].mxu1 %vm288_vm5, %v3806_v34 }
 0x848   : > { %v3577_v44 = vpop.f32.mrb[2].mxu1 }
 0x849   : > { %v3591_v45 = vmul.f32 %v3589_v43, %v3577_v44  ;;  %v3579_v46 = vpop.f32.mrb[3].mxu1 }
 0x84a   : > { %v3592_v48 = vmul.f32 %v3589_v43, %v3579_v46 }
 0x84b   : > { %v3600_v49 = vadd.f32 %v3598_v47, %v3591_v45 }
 0x84c   : > { %v3601_v0 = vadd.f32 %v3598_v47, %v3592_v48 }
 0x84d   : > { %v3602_v36 = vmax.f32 %v3600_v49, 0.0 }
 0x84e   : > { %v3603_v50 = vmax.f32 %v3601_v0, 0.0 }
 0x84f   : > { %3604 = vst [vmem:[%s190_s14] sm:$0xff] %v3602_v36 }
 0x850   : > { %3605 = vst [vmem:[%s190_s14 + $0x8] sm:$0xff] %v3603_v50 }
 0x851   : > { %3950 = shalt.err (!%p3947_p3)
}
 0x852   : > { %s3951_s6 = scalar_lea.hbm %s4616_s30, 256  ;;  %s3955_s9 = scalar_lea.hbm %s4662_s4, 512 }
 0x853   : > { %p3952_p4 = scmp.ne.s32.totalorder %s4616_s30, %s3951_s6  ;;  %p3956_p9 = scmp.lt.u32.totalorder %s4616_s30, %s4662_s4 }
 0x854   : > { %p3957_p10 = scmp.lt.u32.totalorder %s3955_s9, %s3951_s6  ;;  %p3959_p12 = scmp.lt.u32.totalorder %s3951_s6, %s4616_s30 }
 0x855   : > { %p3953_p7 = pnand %p3952_p4, %p4077_p5 }
 0x856   : > { %p3958_p11 = por %p3957_p10, %p3956_p9 }
 0x857   : > { %p3954_p8 = pneg %p3953_p7 }
 0x858   : > { %p3960_p13 = por %p3959_p12, %p3958_p11 }
 0x85a   : > { %p3961_p0 = pnand %p3960_p13, %p3954_p8 }
 0x85c   : > { %3964 = shalt.err (!%p3961_p0)
}
 0x85d   : > { %3883 = dma.vmem_to_hbm [thread:$0]  (%p4077_p5), %s4618_s20, 256, %s4616_s30, %s3607_s5  }
 0x85e PF: > { %p3889_p1 = scmp.ge.s32.totalorder %s3999_s18, 2  ;;  %s3633_s12 = sand.u32 1, %s3987_s15  }
 0x85f   : > { %s3634_s13 = scalar_lea.sflag [#allocation5], %s3633_s12 }
 0x860   : > { %p3886_p2 = pnand %p3889_p1, %p4081_p6 }
 0x862   : > { %3982 = dma.done.wait (!%p3886_p2), %s3634_s13, 256  }
 0x863   : > { %3984 = vsyncadd (!%p3886_p2), %s3634_s13, 4294967040  ;;  %p14_p3 = scmp.ge.s32.totalorder %s4064_s21, 4   ;;  %s4673_s15 = smov %s3991_s16 }
 0x864   : > { %s4674_s16 = smov %s3995_s17  ;;  %s4675_s17 = smov %s4075_s24 }
 0x865   : > { %s4676_s18 = smov %s4064_s21  ;;  %16 = sbr.rel (!%p14_p3) target bundleno = 3 (0x3), region = 112 }
 0x86c   :  { %3639 = vsyncpa [#allocation5], 1 }
 0x86d   :  { %3641 = vsyncpa [#allocation5 + $0x1], 1 }

</bundles_post_ra>
